<compile_context>
chip_gen: v7x
topology: tpu7x:2x2x1
jax: 0.10.0
libtpu: 0.0.40
codegen_flags: <defaults>
</compile_context>

<pallas_src>
import jax
import jax.numpy as jnp
from jax import lax
from jax.experimental import pallas as pl
from jax.experimental.pallas import tpu as pltpu


def _round_up(x, m):
  return -(-x // m) * m


# --------------------------------------------------------------------------
# Fused Pallas kernel (one-hot embedding gather + wavefronted LSTM + FC)
# --------------------------------------------------------------------------
def _make_sentiment_kernel(*, n_layers, T, BB, V, H, O):
  """Builds the fused kernel for one batch block of BB rows (static shapes)."""

  def kernel(*refs):
    ids_ref, emb_ref = refs[0], refs[1]                       # ids block, (Vpad, E) table
    lstm_refs = refs[2:2 + 3 * n_layers]                      # (w_ih, w_hh, b) per layer
    h0_ref, c0_ref, fcw_ref, fcb_ref = refs[2 + 3 * n_layers:6 + 3 * n_layers]
    out_ref, hN_ref, cN_ref = refs[6 + 3 * n_layers:9 + 3 * n_layers]
    (proj_ref,) = refs[9 + 3 * n_layers:]

    # ---- 1) Embedding gather as a one-hot MXU matmul ----------------------
    # ids block is (1, T*BB, 1), rows ordered t-major / batch-minor so each
    # timestep's rows form a contiguous sublane-aligned (BB, :) slab below.
    ids_col = ids_ref[0]                                      # (T*BB, 1) int32
    onehot = (lax.broadcasted_iota(jnp.int32, (T * BB, V), 1)
              == ids_col).astype(jnp.float32)                 # (T*BB, Vpad)
    embeds = jnp.dot(onehot, emb_ref[...],
                     preferred_element_type=jnp.float32)      # (T*BB, E)

    # ---- 2) Hoist layer-0 input projection off the recurrence -------------
    w_ih = [lstm_refs[3 * l][...] for l in range(n_layers)]   # (D_in, 4H)
    w_hh = [lstm_refs[3 * l + 1][...] for l in range(n_layers)]  # (H, 4H)
    bias = [lstm_refs[3 * l + 2][...] for l in range(n_layers)]  # (1, 4H)

    proj_ref[...] = jnp.dot(embeds, w_ih[0],
                            preferred_element_type=jnp.float32) + bias[0]

    h = [h0_ref[l] for l in range(n_layers)]                  # (BB, H) each
    c = [c0_ref[l] for l in range(n_layers)]

    def cell(xp, hl, cl, w_hh_l):
      z = xp + jnp.dot(hl, w_hh_l, preferred_element_type=jnp.float32)  # (BB,4H)
      sig = jax.nn.sigmoid(z)                   # ONE full-width EUP pass
      i_g = sig[:, 0:H]                         # PyTorch gate order: i, f, g, o
      f_g = sig[:, H:2 * H]
      o_g = sig[:, 3 * H:4 * H]
      g_g = jnp.tanh(z[:, 2 * H:3 * H])
      c_new = f_g * cl + i_g * g_g
      h_new = o_g * jnp.tanh(c_new)
      return h_new, c_new

    # ---- 3) Wavefronted stacked LSTM --------------------------------------
    # Serial depth T + n_layers - 1 instead of n_layers * T.  Layers are
    # visited high->low inside a wavefront step so layer l reads h[l-1] from
    # the previous step (time t = s - l) before layer l-1 overwrites it.
    # TODO(synk): switch to lax.fori_loop(unroll=4..8) / weight-stationary
    #             pltpu.matmul_push_rhs if T grows large.
    for s in range(T + n_layers - 1):
      for layer in range(n_layers - 1, -1, -1):
        t = s - layer
        if 0 <= t < T:
          if layer == 0:
            xp = proj_ref[t * BB:(t + 1) * BB, :]
          else:
            xp = jnp.dot(h[layer - 1], w_ih[layer],
                         preferred_element_type=jnp.float32) + bias[layer]
          h[layer], c[layer] = cell(xp, h[layer], c[layer], w_hh[layer])

    for layer in range(n_layers):
      hN_ref[layer] = h[layer]
      cN_ref[layer] = c[layer]

    # ---- 4) FC + sigmoid on the final hidden state only -------------------
    # TODO(synk): nn.Dropout / LSTM inter-layer dropout are identity at
    # inference; training-mode parity would need pltpu.prng_* masks.
    fc_w = fcw_ref[...]                                       # (O, H) PyTorch layout
    fc_b = fcb_ref[...]                                       # (1, O)
    if O == 1:
      logits = jnp.sum(h[n_layers - 1] * fc_w, axis=-1, keepdims=True) + fc_b
    else:
      logits = lax.dot_general(h[n_layers - 1], fc_w, (((1,), (1,)), ((), ())),
                               preferred_element_type=jnp.float32) + fc_b
    out_ref[...] = jax.nn.sigmoid(logits)

  return kernel


# --------------------------------------------------------------------------
# Parameters (PyTorch-equivalent shapes, matmul-friendly layout)
# --------------------------------------------------------------------------
def init_params(key, vocab_size, output_size, embedding_dim, hidden_dim,
                n_layers):
  params = {}
  keys = jax.random.split(key, 2 + 3 * n_layers + 2)
  k_iter = iter(keys)
  scale = 0.1

  params["embedding"] = scale * jax.random.normal(
      next(k_iter), (vocab_size, embedding_dim), jnp.float32)

  params["lstm"] = []
  for layer in range(n_layers):
    d_in = embedding_dim if layer == 0 else hidden_dim
    w_ih = scale * jax.random.normal(                         # PyTorch W_ih^T
        next(k_iter), (d_in, 4 * hidden_dim), jnp.float32)
    w_hh = scale * jax.random.normal(                         # PyTorch W_hh^T
        next(k_iter), (hidden_dim, 4 * hidden_dim), jnp.float32)
    b = scale * jax.random.normal(                            # b_ih + b_hh combined
        next(k_iter), (1, 4 * hidden_dim), jnp.float32)
    params["lstm"].append((w_ih, w_hh, b))

  params["fc_w"] = scale * jax.random.normal(                 # nn.Linear layout (O, H)
      next(k_iter), (output_size, hidden_dim), jnp.float32)
  params["fc_b"] = scale * jax.random.normal(
      next(k_iter), (1, output_size), jnp.float32)
  return params


# --------------------------------------------------------------------------
# SentimentNet forward (single pallas_call, grid over batch blocks)
# --------------------------------------------------------------------------
@jax.jit
def sentiment_net_forward(params, x, hidden):
  """Mirrors SentimentNet.forward (inference).

  x      : (B, T) int token ids
  hidden : (h0, c0), each (n_layers, B, H)
  returns (out, (hN, cN)); out has shape (B,)
  """
  h0, c0 = hidden
  n_layers, B, H = h0.shape
  T = x.shape[1]
  V, E = params["embedding"].shape
  O = params["fc_w"].shape[0]

  BB = 8                                   # batch block = f32 sublane tile
  B_pad = max(BB, _round_up(B, BB))
  n_blk = B_pad // BB
  pad = B_pad - B
  V_pad = _round_up(V, 128)                # lane-dense one-hot / table

  x_p = jnp.pad(x.astype(jnp.int32), ((0, pad), (0, 0)))          # (B_pad, T)
  h0_p = jnp.pad(h0, ((0, 0), (0, pad), (0, 0)))
  c0_p = jnp.pad(c0, ((0, 0), (0, pad), (0, 0)))
  emb_p = jnp.pad(params["embedding"], ((0, V_pad - V), (0, 0)))  # (V_pad, E)

  # Per-block token ids, rows ordered t-major / batch-minor (matches proj_buf).
  ids_blk = (x_p.reshape(n_blk, BB, T)
             .transpose(0, 2, 1)
             .reshape(n_blk, T * BB, 1))

  lstm_flat = []
  for w_ih, w_hh, b in params["lstm"]:
    lstm_flat += [w_ih, w_hh, b]

  kernel = _make_sentiment_kernel(n_layers=n_layers, T=T, BB=BB, V=V_pad,
                                  H=H, O=O)

  def const(shape):
    return pl.BlockSpec(shape, lambda i: (0,) * len(shape))

  in_specs = (
      [pl.BlockSpec((1, T * BB, 1), lambda i: (i, 0, 0)),          # ids block
       const((V_pad, E))]                                          # embedding
      + [const(w.shape) for w in lstm_flat]                        # LSTM weights
      + [pl.BlockSpec((n_layers, BB, H), lambda i: (0, i, 0)),     # h0
         pl.BlockSpec((n_layers, BB, H), lambda i: (0, i, 0)),     # c0
         const(params["fc_w"].shape),
         const(params["fc_b"].shape)])
  out_specs = (
      pl.BlockSpec((BB, O), lambda i: (i, 0)),
      pl.BlockSpec((n_layers, BB, H), lambda i: (0, i, 0)),
      pl.BlockSpec((n_layers, BB, H), lambda i: (0, i, 0)),
  )

  # Scoped-VMEM budget sized to the real footprint (+ headroom), not defaults.
  w_bytes = 4 * (V_pad * E + sum(int(w.size) for w in lstm_flat)
                 + int(params["fc_w"].size) + int(params["fc_b"].size))
  blk_bytes = 4 * (T * BB + 4 * n_layers * BB * H + BB * O)
  scratch_bytes = 4 * (T * BB * 4 * H)
  vmem_limit = int(2 * (w_bytes + blk_bytes + scratch_bytes) + (8 << 20))

  fc_out, hN, cN = pl.pallas_call(
      kernel,
      out_shape=(
          jax.ShapeDtypeStruct((B_pad, O), jnp.float32),
          jax.ShapeDtypeStruct((n_layers, B_pad, H), jnp.float32),
          jax.ShapeDtypeStruct((n_layers, B_pad, H), jnp.float32),
      ),
      grid_spec=pltpu.PrefetchScalarGridSpec(
          num_scalar_prefetch=0,
          grid=(n_blk,),
          in_specs=in_specs,
          out_specs=out_specs,
          scratch_shapes=[
              pltpu.VMEM((T * BB, 4 * H), jnp.float32),   # hoisted layer-0 proj
          ]),
      compiler_params=pltpu.CompilerParams(
          dimension_semantics=("parallel",),
          vmem_limit_bytes=vmem_limit),
  )(ids_blk, emb_p, *lstm_flat, h0_p, c0_p, params["fc_w"], params["fc_b"])

  # out.view(B, -1)[:, -1]  ==  last output unit at the last timestep.
  out = fc_out[:B, -1]
  return out, (hN[:, :B], cN[:, :B])


# --------------------------------------------------------------------------
if __name__ == "__main__":
  vocab_size = 50
  output_size = 1
  embedding_dim = 32
  hidden_dim = 32
  n_layers = 2
  batch = 2
  seq = 8

  key = jax.random.PRNGKey(0)
  k_param, k_tok = jax.random.split(key)

  params = init_params(k_param, vocab_size, output_size, embedding_dim,
                       hidden_dim, n_layers)

  x = jax.random.randint(k_tok, (batch, seq), 0, vocab_size, dtype=jnp.int32)
  # init_hidden: zeros (n_layers, B, H)
  h0 = jnp.zeros((n_layers, batch, hidden_dim), jnp.float32)
  c0 = jnp.zeros((n_layers, batch, hidden_dim), jnp.float32)

  out, (hN, cN) = sentiment_net_forward(params, x, (h0, c0))
  jax.block_until_ready((out, hN, cN))

  assert out.shape == (batch,)
  assert hN.shape == (n_layers, batch, hidden_dim)
  assert cN.shape == (n_layers, batch, hidden_dim)
  assert bool(jnp.all(jnp.isfinite(out)))
  assert bool(jnp.all((out >= 0) & (out <= 1)))
  print("KERNEL_OK")
</pallas_src>

<mosaic_0001>
module attributes {stable_mosaic.version = 11 : i64} {
  func.func @kernel(%arg0: i32, %arg1: memref<1x64x1xi32, #tpu.memory_space<vmem>>, %arg2: memref<128x32xf32, #tpu.memory_space<vmem>>, %arg3: memref<32x128xf32, #tpu.memory_space<vmem>>, %arg4: memref<32x128xf32, #tpu.memory_space<vmem>>, %arg5: memref<1x128xf32, #tpu.memory_space<vmem>>, %arg6: memref<32x128xf32, #tpu.memory_space<vmem>>, %arg7: memref<32x128xf32, #tpu.memory_space<vmem>>, %arg8: memref<1x128xf32, #tpu.memory_space<vmem>>, %arg9: memref<2x8x32xf32, #tpu.memory_space<vmem>>, %arg10: memref<2x8x32xf32, #tpu.memory_space<vmem>>, %arg11: memref<1x32xf32, #tpu.memory_space<vmem>>, %arg12: memref<1x1xf32, #tpu.memory_space<vmem>>, %arg13: memref<8x1xf32, #tpu.memory_space<vmem>>, %arg14: memref<2x8x32xf32, #tpu.memory_space<vmem>>, %arg15: memref<2x8x32xf32, #tpu.memory_space<vmem>>, %arg16: memref<64x128xf32, #tpu.memory_space<vmem>>) attributes {dimension_semantics = [#tpu.dimension_semantics<parallel>], iteration_bounds = array<i64: 1>, scalar_prefetch = 0 : i64, scratch_operands = 1 : i64, tpu.core_type = #tpu.core_type<tc>, window_params = [{transform_indices = @transform_0, window_bounds = array<i64: 1, 64, 1>}, {pipeline_mode = #tpu.pipeline_mode<synchronous>, transform_indices = @transform_1, window_bounds = array<i64: 128, 32>}, {pipeline_mode = #tpu.pipeline_mode<synchronous>, transform_indices = @transform_2, window_bounds = array<i64: 32, 128>}, {pipeline_mode = #tpu.pipeline_mode<synchronous>, transform_indices = @transform_3, window_bounds = array<i64: 32, 128>}, {pipeline_mode = #tpu.pipeline_mode<synchronous>, transform_indices = @transform_4, window_bounds = array<i64: 1, 128>}, {pipeline_mode = #tpu.pipeline_mode<synchronous>, transform_indices = @transform_5, window_bounds = array<i64: 32, 128>}, {pipeline_mode = #tpu.pipeline_mode<synchronous>, transform_indices = @transform_6, window_bounds = array<i64: 32, 128>}, {pipeline_mode = #tpu.pipeline_mode<synchronous>, transform_indices = @transform_7, window_bounds = array<i64: 1, 128>}, {transform_indices = @transform_8, window_bounds = array<i64: 2, 8, 32>}, {transform_indices = @transform_9, window_bounds = array<i64: 2, 8, 32>}, {pipeline_mode = #tpu.pipeline_mode<synchronous>, transform_indices = @transform_10, window_bounds = array<i64: 1, 32>}, {pipeline_mode = #tpu.pipeline_mode<synchronous>, transform_indices = @transform_11, window_bounds = array<i64: 1, 1>}, {transform_indices = @transform_12, window_bounds = array<i64: 8, 1>}, {transform_indices = @transform_13, window_bounds = array<i64: 2, 8, 32>}, {transform_indices = @transform_14, window_bounds = array<i64: 2, 8, 32>}]} {
    %c0 = arith.constant 0 : index
    %c0_0 = arith.constant 0 : index
    %c0_1 = arith.constant 0 : index
    %0 = vector.load %arg1[%c0, %c0_0, %c0_1] : memref<1x64x1xi32, #tpu.memory_space<vmem>>, vector<1x64x1xi32>
    %1 = vector.shape_cast %0 : vector<1x64x1xi32> to vector<64x1xi32>
    %2 = tpu.iota {dimensions = array<i32: 1>} : vector<64x128xi32>
    %3 = vector.broadcast %1 : vector<64x1xi32> to vector<64x128xi32>
    %4 = arith.cmpi eq, %2, %3 : vector<64x128xi32>
    %5 = arith.extui %4 : vector<64x128xi1> to vector<64x128xi32>
    %6 = arith.sitofp %5 : vector<64x128xi32> to vector<64x128xf32>
    %c0_2 = arith.constant 0 : index
    %c0_3 = arith.constant 0 : index
    %7 = vector.load %arg2[%c0_2, %c0_3] : memref<128x32xf32, #tpu.memory_space<vmem>>, vector<128x32xf32>
    %cst = arith.constant dense<0.000000e+00> : vector<64x32xf32>
    %8 = tpu.matmul %6, %7, %cst {dimension_numbers = #tpu.dot_dimension_numbers<[1], [0], [0], [1], [0, 0, 1, 1], [], []>} : vector<64x128xf32>, vector<128x32xf32>, vector<64x32xf32> -> vector<64x32xf32>
    %c0_4 = arith.constant 0 : index
    %c0_5 = arith.constant 0 : index
    %9 = vector.load %arg3[%c0_4, %c0_5] : memref<32x128xf32, #tpu.memory_space<vmem>>, vector<32x128xf32>
    %c0_6 = arith.constant 0 : index
    %c0_7 = arith.constant 0 : index
    %10 = vector.load %arg6[%c0_6, %c0_7] : memref<32x128xf32, #tpu.memory_space<vmem>>, vector<32x128xf32>
    %c0_8 = arith.constant 0 : index
    %c0_9 = arith.constant 0 : index
    %11 = vector.load %arg4[%c0_8, %c0_9] : memref<32x128xf32, #tpu.memory_space<vmem>>, vector<32x128xf32>
    %c0_10 = arith.constant 0 : index
    %c0_11 = arith.constant 0 : index
    %12 = vector.load %arg7[%c0_10, %c0_11] : memref<32x128xf32, #tpu.memory_space<vmem>>, vector<32x128xf32>
    %c0_12 = arith.constant 0 : index
    %c0_13 = arith.constant 0 : index
    %13 = vector.load %arg5[%c0_12, %c0_13] : memref<1x128xf32, #tpu.memory_space<vmem>>, vector<1x128xf32>
    %c0_14 = arith.constant 0 : index
    %c0_15 = arith.constant 0 : index
    %14 = vector.load %arg8[%c0_14, %c0_15] : memref<1x128xf32, #tpu.memory_space<vmem>>, vector<1x128xf32>
    %cst_16 = arith.constant dense<0.000000e+00> : vector<64x128xf32>
    %15 = tpu.matmul %8, %9, %cst_16 {dimension_numbers = #tpu.dot_dimension_numbers<[1], [0], [0], [1], [0, 0, 1, 1], [], []>} : vector<64x32xf32>, vector<32x128xf32>, vector<64x128xf32> -> vector<64x128xf32>
    %16 = vector.broadcast %13 : vector<1x128xf32> to vector<64x128xf32>
    %17 = arith.addf %15, %16 : vector<64x128xf32>
    %c0_17 = arith.constant 0 : index
    %c0_18 = arith.constant 0 : index
    %18 = vector.load %arg16[%c0_17, %c0_18] : memref<64x128xf32, #tpu.memory_space<vmem>>, vector<64x128xf32>
    tpu.vector_store %arg16[%c0_17, %c0_18], %17 {strides = array<i32>} : memref<64x128xf32, #tpu.memory_space<vmem>>, vector<64x128xf32>,
    %c0_19 = arith.constant 0 : index
    %c0_20 = arith.constant 0 : index
    %c0_21 = arith.constant 0 : index
    %19 = vector.load %arg9[%c0_19, %c0_20, %c0_21] : memref<2x8x32xf32, #tpu.memory_space<vmem>>, vector<1x8x32xf32>
    %20 = vector.shape_cast %19 : vector<1x8x32xf32> to vector<8x32xf32>
    %c1 = arith.constant 1 : index
    %c0_22 = arith.constant 0 : index
    %c0_23 = arith.constant 0 : index
    %21 = vector.load %arg9[%c1, %c0_22, %c0_23] : memref<2x8x32xf32, #tpu.memory_space<vmem>>, vector<1x8x32xf32>
    %22 = vector.shape_cast %21 : vector<1x8x32xf32> to vector<8x32xf32>
    %c0_24 = arith.constant 0 : index
    %c0_25 = arith.constant 0 : index
    %c0_26 = arith.constant 0 : index
    %23 = vector.load %arg10[%c0_24, %c0_25, %c0_26] : memref<2x8x32xf32, #tpu.memory_space<vmem>>, vector<1x8x32xf32>
    %24 = vector.shape_cast %23 : vector<1x8x32xf32> to vector<8x32xf32>
    %c1_27 = arith.constant 1 : index
    %c0_28 = arith.constant 0 : index
    %c0_29 = arith.constant 0 : index
    %25 = vector.load %arg10[%c1_27, %c0_28, %c0_29] : memref<2x8x32xf32, #tpu.memory_space<vmem>>, vector<1x8x32xf32>
    %26 = vector.shape_cast %25 : vector<1x8x32xf32> to vector<8x32xf32>
    %c0_30 = arith.constant 0 : index
    %c0_31 = arith.constant 0 : index
    %27 = vector.load %arg16[%c0_30, %c0_31] : memref<64x128xf32, #tpu.memory_space<vmem>>, vector<8x128xf32>
    %cst_32 = arith.constant dense<0.000000e+00> : vector<8x128xf32>
    %28 = tpu.matmul %20, %11, %cst_32 {dimension_numbers = #tpu.dot_dimension_numbers<[1], [0], [0], [1], [0, 0, 1, 1], [], []>} : vector<8x32xf32>, vector<32x128xf32>, vector<8x128xf32> -> vector<8x128xf32>
    %29 = arith.addf %27, %28 : vector<8x128xf32>
    %30 = arith.negf %29 : vector<8x128xf32>
    %31 = math.exp %30 : vector<8x128xf32>
    %cst_33 = arith.constant 1.000000e+00 : f32
    %32 = vector.broadcast %cst_33 : f32 to vector<8x128xf32>
    %33 = arith.addf %32, %31 : vector<8x128xf32>
    %34 = arith.divf %32, %33 : vector<8x128xf32>
    %35 = vector.extract_strided_slice %34 {offsets = [0, 0], sizes = [8, 32], strides = [1, 1]} : vector<8x128xf32> to vector<8x32xf32>
    %36 = vector.extract_strided_slice %34 {offsets = [0, 32], sizes = [8, 32], strides = [1, 1]} : vector<8x128xf32> to vector<8x32xf32>
    %37 = vector.extract_strided_slice %34 {offsets = [0, 96], sizes = [8, 32], strides = [1, 1]} : vector<8x128xf32> to vector<8x32xf32>
    %38 = vector.extract_strided_slice %29 {offsets = [0, 64], sizes = [8, 32], strides = [1, 1]} : vector<8x128xf32> to vector<8x32xf32>
    %39 = math.tanh %38 : vector<8x32xf32>
    %40 = arith.mulf %36, %24 : vector<8x32xf32>
    %41 = arith.mulf %35, %39 : vector<8x32xf32>
    %42 = arith.addf %40, %41 : vector<8x32xf32>
    %43 = math.tanh %42 : vector<8x32xf32>
    %44 = arith.mulf %37, %43 : vector<8x32xf32>
    %cst_34 = arith.constant dense<0.000000e+00> : vector<8x128xf32>
    %45 = tpu.matmul %44, %10, %cst_34 {dimension_numbers = #tpu.dot_dimension_numbers<[1], [0], [0], [1], [0, 0, 1, 1], [], []>} : vector<8x32xf32>, vector<32x128xf32>, vector<8x128xf32> -> vector<8x128xf32>
    %46 = vector.broadcast %14 : vector<1x128xf32> to vector<8x128xf32>
    %47 = arith.addf %45, %46 : vector<8x128xf32>
    %cst_35 = arith.constant dense<0.000000e+00> : vector<8x128xf32>
    %48 = tpu.matmul %22, %12, %cst_35 {dimension_numbers = #tpu.dot_dimension_numbers<[1], [0], [0], [1], [0, 0, 1, 1], [], []>} : vector<8x32xf32>, vector<32x128xf32>, vector<8x128xf32> -> vector<8x128xf32>
    %49 = arith.addf %47, %48 : vector<8x128xf32>
    %50 = arith.negf %49 : vector<8x128xf32>
    %51 = math.exp %50 : vector<8x128xf32>
    %cst_36 = arith.constant 1.000000e+00 : f32
    %52 = vector.broadcast %cst_36 : f32 to vector<8x128xf32>
    %53 = arith.addf %52, %51 : vector<8x128xf32>
    %54 = arith.divf %52, %53 : vector<8x128xf32>
    %55 = vector.extract_strided_slice %54 {offsets = [0, 0], sizes = [8, 32], strides = [1, 1]} : vector<8x128xf32> to vector<8x32xf32>
    %56 = vector.extract_strided_slice %54 {offsets = [0, 32], sizes = [8, 32], strides = [1, 1]} : vector<8x128xf32> to vector<8x32xf32>
    %57 = vector.extract_strided_slice %54 {offsets = [0, 96], sizes = [8, 32], strides = [1, 1]} : vector<8x128xf32> to vector<8x32xf32>
    %58 = vector.extract_strided_slice %49 {offsets = [0, 64], sizes = [8, 32], strides = [1, 1]} : vector<8x128xf32> to vector<8x32xf32>
    %59 = math.tanh %58 : vector<8x32xf32>
    %60 = arith.mulf %56, %26 : vector<8x32xf32>
    %61 = arith.mulf %55, %59 : vector<8x32xf32>
    %62 = arith.addf %60, %61 : vector<8x32xf32>
    %63 = math.tanh %62 : vector<8x32xf32>
    %64 = arith.mulf %57, %63 : vector<8x32xf32>
    %c8 = arith.constant 8 : index
    %c0_37 = arith.constant 0 : index
    %65 = vector.load %arg16[%c8, %c0_37] : memref<64x128xf32, #tpu.memory_space<vmem>>, vector<8x128xf32>
    %cst_38 = arith.constant dense<0.000000e+00> : vector<8x128xf32>
    %66 = tpu.matmul %44, %11, %cst_38 {dimension_numbers = #tpu.dot_dimension_numbers<[1], [0], [0], [1], [0, 0, 1, 1], [], []>} : vector<8x32xf32>, vector<32x128xf32>, vector<8x128xf32> -> vector<8x128xf32>
    %67 = arith.addf %65, %66 : vector<8x128xf32>
    %68 = arith.negf %67 : vector<8x128xf32>
    %69 = math.exp %68 : vector<8x128xf32>
    %cst_39 = arith.constant 1.000000e+00 : f32
    %70 = vector.broadcast %cst_39 : f32 to vector<8x128xf32>
    %71 = arith.addf %70, %69 : vector<8x128xf32>
    %72 = arith.divf %70, %71 : vector<8x128xf32>
    %73 = vector.extract_strided_slice %72 {offsets = [0, 0], sizes = [8, 32], strides = [1, 1]} : vector<8x128xf32> to vector<8x32xf32>
    %74 = vector.extract_strided_slice %72 {offsets = [0, 32], sizes = [8, 32], strides = [1, 1]} : vector<8x128xf32> to vector<8x32xf32>
    %75 = vector.extract_strided_slice %72 {offsets = [0, 96], sizes = [8, 32], strides = [1, 1]} : vector<8x128xf32> to vector<8x32xf32>
    %76 = vector.extract_strided_slice %67 {offsets = [0, 64], sizes = [8, 32], strides = [1, 1]} : vector<8x128xf32> to vector<8x32xf32>
    %77 = math.tanh %76 : vector<8x32xf32>
    %78 = arith.mulf %74, %42 : vector<8x32xf32>
    %79 = arith.mulf %73, %77 : vector<8x32xf32>
    %80 = arith.addf %78, %79 : vector<8x32xf32>
    %81 = math.tanh %80 : vector<8x32xf32>
    %82 = arith.mulf %75, %81 : vector<8x32xf32>
    %cst_40 = arith.constant dense<0.000000e+00> : vector<8x128xf32>
    %83 = tpu.matmul %82, %10, %cst_40 {dimension_numbers = #tpu.dot_dimension_numbers<[1], [0], [0], [1], [0, 0, 1, 1], [], []>} : vector<8x32xf32>, vector<32x128xf32>, vector<8x128xf32> -> vector<8x128xf32>
    %84 = vector.broadcast %14 : vector<1x128xf32> to vector<8x128xf32>
    %85 = arith.addf %83, %84 : vector<8x128xf32>
    %cst_41 = arith.constant dense<0.000000e+00> : vector<8x128xf32>
    %86 = tpu.matmul %64, %12, %cst_41 {dimension_numbers = #tpu.dot_dimension_numbers<[1], [0], [0], [1], [0, 0, 1, 1], [], []>} : vector<8x32xf32>, vector<32x128xf32>, vector<8x128xf32> -> vector<8x128xf32>
    %87 = arith.addf %85, %86 : vector<8x128xf32>
    %88 = arith.negf %87 : vector<8x128xf32>
    %89 = math.exp %88 : vector<8x128xf32>
    %cst_42 = arith.constant 1.000000e+00 : f32
    %90 = vector.broadcast %cst_42 : f32 to vector<8x128xf32>
    %91 = arith.addf %90, %89 : vector<8x128xf32>
    %92 = arith.divf %90, %91 : vector<8x128xf32>
    %93 = vector.extract_strided_slice %92 {offsets = [0, 0], sizes = [8, 32], strides = [1, 1]} : vector<8x128xf32> to vector<8x32xf32>
    %94 = vector.extract_strided_slice %92 {offsets = [0, 32], sizes = [8, 32], strides = [1, 1]} : vector<8x128xf32> to vector<8x32xf32>
    %95 = vector.extract_strided_slice %92 {offsets = [0, 96], sizes = [8, 32], strides = [1, 1]} : vector<8x128xf32> to vector<8x32xf32>
    %96 = vector.extract_strided_slice %87 {offsets = [0, 64], sizes = [8, 32], strides = [1, 1]} : vector<8x128xf32> to vector<8x32xf32>
    %97 = math.tanh %96 : vector<8x32xf32>
    %98 = arith.mulf %94, %62 : vector<8x32xf32>
    %99 = arith.mulf %93, %97 : vector<8x32xf32>
    %100 = arith.addf %98, %99 : vector<8x32xf32>
    %101 = math.tanh %100 : vector<8x32xf32>
    %102 = arith.mulf %95, %101 : vector<8x32xf32>
    %c16 = arith.constant 16 : index
    %c0_43 = arith.constant 0 : index
    %103 = vector.load %arg16[%c16, %c0_43] : memref<64x128xf32, #tpu.memory_space<vmem>>, vector<8x128xf32>
    %cst_44 = arith.constant dense<0.000000e+00> : vector<8x128xf32>
    %104 = tpu.matmul %82, %11, %cst_44 {dimension_numbers = #tpu.dot_dimension_numbers<[1], [0], [0], [1], [0, 0, 1, 1], [], []>} : vector<8x32xf32>, vector<32x128xf32>, vector<8x128xf32> -> vector<8x128xf32>
    %105 = arith.addf %103, %104 : vector<8x128xf32>
    %106 = arith.negf %105 : vector<8x128xf32>
    %107 = math.exp %106 : vector<8x128xf32>
    %cst_45 = arith.constant 1.000000e+00 : f32
    %108 = vector.broadcast %cst_45 : f32 to vector<8x128xf32>
    %109 = arith.addf %108, %107 : vector<8x128xf32>
    %110 = arith.divf %108, %109 : vector<8x128xf32>
    %111 = vector.extract_strided_slice %110 {offsets = [0, 0], sizes = [8, 32], strides = [1, 1]} : vector<8x128xf32> to vector<8x32xf32>
    %112 = vector.extract_strided_slice %110 {offsets = [0, 32], sizes = [8, 32], strides = [1, 1]} : vector<8x128xf32> to vector<8x32xf32>
    %113 = vector.extract_strided_slice %110 {offsets = [0, 96], sizes = [8, 32], strides = [1, 1]} : vector<8x128xf32> to vector<8x32xf32>
    %114 = vector.extract_strided_slice %105 {offsets = [0, 64], sizes = [8, 32], strides = [1, 1]} : vector<8x128xf32> to vector<8x32xf32>
    %115 = math.tanh %114 : vector<8x32xf32>
    %116 = arith.mulf %112, %80 : vector<8x32xf32>
    %117 = arith.mulf %111, %115 : vector<8x32xf32>
    %118 = arith.addf %116, %117 : vector<8x32xf32>
    %119 = math.tanh %118 : vector<8x32xf32>
    %120 = arith.mulf %113, %119 : vector<8x32xf32>
    %cst_46 = arith.constant dense<0.000000e+00> : vector<8x128xf32>
    %121 = tpu.matmul %120, %10, %cst_46 {dimension_numbers = #tpu.dot_dimension_numbers<[1], [0], [0], [1], [0, 0, 1, 1], [], []>} : vector<8x32xf32>, vector<32x128xf32>, vector<8x128xf32> -> vector<8x128xf32>
    %122 = vector.broadcast %14 : vector<1x128xf32> to vector<8x128xf32>
    %123 = arith.addf %121, %122 : vector<8x128xf32>
    %cst_47 = arith.constant dense<0.000000e+00> : vector<8x128xf32>
    %124 = tpu.matmul %102, %12, %cst_47 {dimension_numbers = #tpu.dot_dimension_numbers<[1], [0], [0], [1], [0, 0, 1, 1], [], []>} : vector<8x32xf32>, vector<32x128xf32>, vector<8x128xf32> -> vector<8x128xf32>
    %125 = arith.addf %123, %124 : vector<8x128xf32>
    %126 = arith.negf %125 : vector<8x128xf32>
    %127 = math.exp %126 : vector<8x128xf32>
    %cst_48 = arith.constant 1.000000e+00 : f32
    %128 = vector.broadcast %cst_48 : f32 to vector<8x128xf32>
    %129 = arith.addf %128, %127 : vector<8x128xf32>
    %130 = arith.divf %128, %129 : vector<8x128xf32>
    %131 = vector.extract_strided_slice %130 {offsets = [0, 0], sizes = [8, 32], strides = [1, 1]} : vector<8x128xf32> to vector<8x32xf32>
    %132 = vector.extract_strided_slice %130 {offsets = [0, 32], sizes = [8, 32], strides = [1, 1]} : vector<8x128xf32> to vector<8x32xf32>
    %133 = vector.extract_strided_slice %130 {offsets = [0, 96], sizes = [8, 32], strides = [1, 1]} : vector<8x128xf32> to vector<8x32xf32>
    %134 = vector.extract_strided_slice %125 {offsets = [0, 64], sizes = [8, 32], strides = [1, 1]} : vector<8x128xf32> to vector<8x32xf32>
    %135 = math.tanh %134 : vector<8x32xf32>
    %136 = arith.mulf %132, %100 : vector<8x32xf32>
    %137 = arith.mulf %131, %135 : vector<8x32xf32>
    %138 = arith.addf %136, %137 : vector<8x32xf32>
    %139 = math.tanh %138 : vector<8x32xf32>
    %140 = arith.mulf %133, %139 : vector<8x32xf32>
    %c24 = arith.constant 24 : index
    %c0_49 = arith.constant 0 : index
    %141 = vector.load %arg16[%c24, %c0_49] : memref<64x128xf32, #tpu.memory_space<vmem>>, vector<8x128xf32>
    %cst_50 = arith.constant dense<0.000000e+00> : vector<8x128xf32>
    %142 = tpu.matmul %120, %11, %cst_50 {dimension_numbers = #tpu.dot_dimension_numbers<[1], [0], [0], [1], [0, 0, 1, 1], [], []>} : vector<8x32xf32>, vector<32x128xf32>, vector<8x128xf32> -> vector<8x128xf32>
    %143 = arith.addf %141, %142 : vector<8x128xf32>
    %144 = arith.negf %143 : vector<8x128xf32>
    %145 = math.exp %144 : vector<8x128xf32>
    %cst_51 = arith.constant 1.000000e+00 : f32
    %146 = vector.broadcast %cst_51 : f32 to vector<8x128xf32>
    %147 = arith.addf %146, %145 : vector<8x128xf32>
    %148 = arith.divf %146, %147 : vector<8x128xf32>
    %149 = vector.extract_strided_slice %148 {offsets = [0, 0], sizes = [8, 32], strides = [1, 1]} : vector<8x128xf32> to vector<8x32xf32>
    %150 = vector.extract_strided_slice %148 {offsets = [0, 32], sizes = [8, 32], strides = [1, 1]} : vector<8x128xf32> to vector<8x32xf32>
    %151 = vector.extract_strided_slice %148 {offsets = [0, 96], sizes = [8, 32], strides = [1, 1]} : vector<8x128xf32> to vector<8x32xf32>
    %152 = vector.extract_strided_slice %143 {offsets = [0, 64], sizes = [8, 32], strides = [1, 1]} : vector<8x128xf32> to vector<8x32xf32>
    %153 = math.tanh %152 : vector<8x32xf32>
    %154 = arith.mulf %150, %118 : vector<8x32xf32>
    %155 = arith.mulf %149, %153 : vector<8x32xf32>
    %156 = arith.addf %154, %155 : vector<8x32xf32>
    %157 = math.tanh %156 : vector<8x32xf32>
    %158 = arith.mulf %151, %157 : vector<8x32xf32>
    %cst_52 = arith.constant dense<0.000000e+00> : vector<8x128xf32>
    %159 = tpu.matmul %158, %10, %cst_52 {dimension_numbers = #tpu.dot_dimension_numbers<[1], [0], [0], [1], [0, 0, 1, 1], [], []>} : vector<8x32xf32>, vector<32x128xf32>, vector<8x128xf32> -> vector<8x128xf32>
    %160 = vector.broadcast %14 : vector<1x128xf32> to vector<8x128xf32>
    %161 = arith.addf %159, %160 : vector<8x128xf32>
    %cst_53 = arith.constant dense<0.000000e+00> : vector<8x128xf32>
    %162 = tpu.matmul %140, %12, %cst_53 {dimension_numbers = #tpu.dot_dimension_numbers<[1], [0], [0], [1], [0, 0, 1, 1], [], []>} : vector<8x32xf32>, vector<32x128xf32>, vector<8x128xf32> -> vector<8x128xf32>
    %163 = arith.addf %161, %162 : vector<8x128xf32>
    %164 = arith.negf %163 : vector<8x128xf32>
    %165 = math.exp %164 : vector<8x128xf32>
    %cst_54 = arith.constant 1.000000e+00 : f32
    %166 = vector.broadcast %cst_54 : f32 to vector<8x128xf32>
    %167 = arith.addf %166, %165 : vector<8x128xf32>
    %168 = arith.divf %166, %167 : vector<8x128xf32>
    %169 = vector.extract_strided_slice %168 {offsets = [0, 0], sizes = [8, 32], strides = [1, 1]} : vector<8x128xf32> to vector<8x32xf32>
    %170 = vector.extract_strided_slice %168 {offsets = [0, 32], sizes = [8, 32], strides = [1, 1]} : vector<8x128xf32> to vector<8x32xf32>
    %171 = vector.extract_strided_slice %168 {offsets = [0, 96], sizes = [8, 32], strides = [1, 1]} : vector<8x128xf32> to vector<8x32xf32>
    %172 = vector.extract_strided_slice %163 {offsets = [0, 64], sizes = [8, 32], strides = [1, 1]} : vector<8x128xf32> to vector<8x32xf32>
    %173 = math.tanh %172 : vector<8x32xf32>
    %174 = arith.mulf %170, %138 : vector<8x32xf32>
    %175 = arith.mulf %169, %173 : vector<8x32xf32>
    %176 = arith.addf %174, %175 : vector<8x32xf32>
    %177 = math.tanh %176 : vector<8x32xf32>
    %178 = arith.mulf %171, %177 : vector<8x32xf32>
    %c32 = arith.constant 32 : index
    %c0_55 = arith.constant 0 : index
    %179 = vector.load %arg16[%c32, %c0_55] : memref<64x128xf32, #tpu.memory_space<vmem>>, vector<8x128xf32>
    %cst_56 = arith.constant dense<0.000000e+00> : vector<8x128xf32>
    %180 = tpu.matmul %158, %11, %cst_56 {dimension_numbers = #tpu.dot_dimension_numbers<[1], [0], [0], [1], [0, 0, 1, 1], [], []>} : vector<8x32xf32>, vector<32x128xf32>, vector<8x128xf32> -> vector<8x128xf32>
    %181 = arith.addf %179, %180 : vector<8x128xf32>
    %182 = arith.negf %181 : vector<8x128xf32>
    %183 = math.exp %182 : vector<8x128xf32>
    %cst_57 = arith.constant 1.000000e+00 : f32
    %184 = vector.broadcast %cst_57 : f32 to vector<8x128xf32>
    %185 = arith.addf %184, %183 : vector<8x128xf32>
    %186 = arith.divf %184, %185 : vector<8x128xf32>
    %187 = vector.extract_strided_slice %186 {offsets = [0, 0], sizes = [8, 32], strides = [1, 1]} : vector<8x128xf32> to vector<8x32xf32>
    %188 = vector.extract_strided_slice %186 {offsets = [0, 32], sizes = [8, 32], strides = [1, 1]} : vector<8x128xf32> to vector<8x32xf32>
    %189 = vector.extract_strided_slice %186 {offsets = [0, 96], sizes = [8, 32], strides = [1, 1]} : vector<8x128xf32> to vector<8x32xf32>
    %190 = vector.extract_strided_slice %181 {offsets = [0, 64], sizes = [8, 32], strides = [1, 1]} : vector<8x128xf32> to vector<8x32xf32>
    %191 = math.tanh %190 : vector<8x32xf32>
    %192 = arith.mulf %188, %156 : vector<8x32xf32>
    %193 = arith.mulf %187, %191 : vector<8x32xf32>
    %194 = arith.addf %192, %193 : vector<8x32xf32>
    %195 = math.tanh %194 : vector<8x32xf32>
    %196 = arith.mulf %189, %195 : vector<8x32xf32>
    %cst_58 = arith.constant dense<0.000000e+00> : vector<8x128xf32>
    %197 = tpu.matmul %196, %10, %cst_58 {dimension_numbers = #tpu.dot_dimension_numbers<[1], [0], [0], [1], [0, 0, 1, 1], [], []>} : vector<8x32xf32>, vector<32x128xf32>, vector<8x128xf32> -> vector<8x128xf32>
    %198 = vector.broadcast %14 : vector<1x128xf32> to vector<8x128xf32>
    %199 = arith.addf %197, %198 : vector<8x128xf32>
    %cst_59 = arith.constant dense<0.000000e+00> : vector<8x128xf32>
    %200 = tpu.matmul %178, %12, %cst_59 {dimension_numbers = #tpu.dot_dimension_numbers<[1], [0], [0], [1], [0, 0, 1, 1], [], []>} : vector<8x32xf32>, vector<32x128xf32>, vector<8x128xf32> -> vector<8x128xf32>
    %201 = arith.addf %199, %200 : vector<8x128xf32>
    %202 = arith.negf %201 : vector<8x128xf32>
    %203 = math.exp %202 : vector<8x128xf32>
    %cst_60 = arith.constant 1.000000e+00 : f32
    %204 = vector.broadcast %cst_60 : f32 to vector<8x128xf32>
    %205 = arith.addf %204, %203 : vector<8x128xf32>
    %206 = arith.divf %204, %205 : vector<8x128xf32>
    %207 = vector.extract_strided_slice %206 {offsets = [0, 0], sizes = [8, 32], strides = [1, 1]} : vector<8x128xf32> to vector<8x32xf32>
    %208 = vector.extract_strided_slice %206 {offsets = [0, 32], sizes = [8, 32], strides = [1, 1]} : vector<8x128xf32> to vector<8x32xf32>
    %209 = vector.extract_strided_slice %206 {offsets = [0, 96], sizes = [8, 32], strides = [1, 1]} : vector<8x128xf32> to vector<8x32xf32>
    %210 = vector.extract_strided_slice %201 {offsets = [0, 64], sizes = [8, 32], strides = [1, 1]} : vector<8x128xf32> to vector<8x32xf32>
    %211 = math.tanh %210 : vector<8x32xf32>
    %212 = arith.mulf %208, %176 : vector<8x32xf32>
    %213 = arith.mulf %207, %211 : vector<8x32xf32>
    %214 = arith.addf %212, %213 : vector<8x32xf32>
    %215 = math.tanh %214 : vector<8x32xf32>
    %216 = arith.mulf %209, %215 : vector<8x32xf32>
    %c40 = arith.constant 40 : index
    %c0_61 = arith.constant 0 : index
    %217 = vector.load %arg16[%c40, %c0_61] : memref<64x128xf32, #tpu.memory_space<vmem>>, vector<8x128xf32>
    %cst_62 = arith.constant dense<0.000000e+00> : vector<8x128xf32>
    %218 = tpu.matmul %196, %11, %cst_62 {dimension_numbers = #tpu.dot_dimension_numbers<[1], [0], [0], [1], [0, 0, 1, 1], [], []>} : vector<8x32xf32>, vector<32x128xf32>, vector<8x128xf32> -> vector<8x128xf32>
    %219 = arith.addf %217, %218 : vector<8x128xf32>
    %220 = arith.negf %219 : vector<8x128xf32>
    %221 = math.exp %220 : vector<8x128xf32>
    %cst_63 = arith.constant 1.000000e+00 : f32
    %222 = vector.broadcast %cst_63 : f32 to vector<8x128xf32>
    %223 = arith.addf %222, %221 : vector<8x128xf32>
    %224 = arith.divf %222, %223 : vector<8x128xf32>
    %225 = vector.extract_strided_slice %224 {offsets = [0, 0], sizes = [8, 32], strides = [1, 1]} : vector<8x128xf32> to vector<8x32xf32>
    %226 = vector.extract_strided_slice %224 {offsets = [0, 32], sizes = [8, 32], strides = [1, 1]} : vector<8x128xf32> to vector<8x32xf32>
    %227 = vector.extract_strided_slice %224 {offsets = [0, 96], sizes = [8, 32], strides = [1, 1]} : vector<8x128xf32> to vector<8x32xf32>
    %228 = vector.extract_strided_slice %219 {offsets = [0, 64], sizes = [8, 32], strides = [1, 1]} : vector<8x128xf32> to vector<8x32xf32>
    %229 = math.tanh %228 : vector<8x32xf32>
    %230 = arith.mulf %226, %194 : vector<8x32xf32>
    %231 = arith.mulf %225, %229 : vector<8x32xf32>
    %232 = arith.addf %230, %231 : vector<8x32xf32>
    %233 = math.tanh %232 : vector<8x32xf32>
    %234 = arith.mulf %227, %233 : vector<8x32xf32>
    %cst_64 = arith.constant dense<0.000000e+00> : vector<8x128xf32>
    %235 = tpu.matmul %234, %10, %cst_64 {dimension_numbers = #tpu.dot_dimension_numbers<[1], [0], [0], [1], [0, 0, 1, 1], [], []>} : vector<8x32xf32>, vector<32x128xf32>, vector<8x128xf32> -> vector<8x128xf32>
    %236 = vector.broadcast %14 : vector<1x128xf32> to vector<8x128xf32>
    %237 = arith.addf %235, %236 : vector<8x128xf32>
    %cst_65 = arith.constant dense<0.000000e+00> : vector<8x128xf32>
    %238 = tpu.matmul %216, %12, %cst_65 {dimension_numbers = #tpu.dot_dimension_numbers<[1], [0], [0], [1], [0, 0, 1, 1], [], []>} : vector<8x32xf32>, vector<32x128xf32>, vector<8x128xf32> -> vector<8x128xf32>
    %239 = arith.addf %237, %238 : vector<8x128xf32>
    %240 = arith.negf %239 : vector<8x128xf32>
    %241 = math.exp %240 : vector<8x128xf32>
    %cst_66 = arith.constant 1.000000e+00 : f32
    %242 = vector.broadcast %cst_66 : f32 to vector<8x128xf32>
    %243 = arith.addf %242, %241 : vector<8x128xf32>
    %244 = arith.divf %242, %243 : vector<8x128xf32>
    %245 = vector.extract_strided_slice %244 {offsets = [0, 0], sizes = [8, 32], strides = [1, 1]} : vector<8x128xf32> to vector<8x32xf32>
    %246 = vector.extract_strided_slice %244 {offsets = [0, 32], sizes = [8, 32], strides = [1, 1]} : vector<8x128xf32> to vector<8x32xf32>
    %247 = vector.extract_strided_slice %244 {offsets = [0, 96], sizes = [8, 32], strides = [1, 1]} : vector<8x128xf32> to vector<8x32xf32>
    %248 = vector.extract_strided_slice %239 {offsets = [0, 64], sizes = [8, 32], strides = [1, 1]} : vector<8x128xf32> to vector<8x32xf32>
    %249 = math.tanh %248 : vector<8x32xf32>
    %250 = arith.mulf %246, %214 : vector<8x32xf32>
    %251 = arith.mulf %245, %249 : vector<8x32xf32>
    %252 = arith.addf %250, %251 : vector<8x32xf32>
    %253 = math.tanh %252 : vector<8x32xf32>
    %254 = arith.mulf %247, %253 : vector<8x32xf32>
    %c48 = arith.constant 48 : index
    %c0_67 = arith.constant 0 : index
    %255 = vector.load %arg16[%c48, %c0_67] : memref<64x128xf32, #tpu.memory_space<vmem>>, vector<8x128xf32>
    %cst_68 = arith.constant dense<0.000000e+00> : vector<8x128xf32>
    %256 = tpu.matmul %234, %11, %cst_68 {dimension_numbers = #tpu.dot_dimension_numbers<[1], [0], [0], [1], [0, 0, 1, 1], [], []>} : vector<8x32xf32>, vector<32x128xf32>, vector<8x128xf32> -> vector<8x128xf32>
    %257 = arith.addf %255, %256 : vector<8x128xf32>
    %258 = arith.negf %257 : vector<8x128xf32>
    %259 = math.exp %258 : vector<8x128xf32>
    %cst_69 = arith.constant 1.000000e+00 : f32
    %260 = vector.broadcast %cst_69 : f32 to vector<8x128xf32>
    %261 = arith.addf %260, %259 : vector<8x128xf32>
    %262 = arith.divf %260, %261 : vector<8x128xf32>
    %263 = vector.extract_strided_slice %262 {offsets = [0, 0], sizes = [8, 32], strides = [1, 1]} : vector<8x128xf32> to vector<8x32xf32>
    %264 = vector.extract_strided_slice %262 {offsets = [0, 32], sizes = [8, 32], strides = [1, 1]} : vector<8x128xf32> to vector<8x32xf32>
    %265 = vector.extract_strided_slice %262 {offsets = [0, 96], sizes = [8, 32], strides = [1, 1]} : vector<8x128xf32> to vector<8x32xf32>
    %266 = vector.extract_strided_slice %257 {offsets = [0, 64], sizes = [8, 32], strides = [1, 1]} : vector<8x128xf32> to vector<8x32xf32>
    %267 = math.tanh %266 : vector<8x32xf32>
    %268 = arith.mulf %264, %232 : vector<8x32xf32>
    %269 = arith.mulf %263, %267 : vector<8x32xf32>
    %270 = arith.addf %268, %269 : vector<8x32xf32>
    %271 = math.tanh %270 : vector<8x32xf32>
    %272 = arith.mulf %265, %271 : vector<8x32xf32>
    %cst_70 = arith.constant dense<0.000000e+00> : vector<8x128xf32>
    %273 = tpu.matmul %272, %10, %cst_70 {dimension_numbers = #tpu.dot_dimension_numbers<[1], [0], [0], [1], [0, 0, 1, 1], [], []>} : vector<8x32xf32>, vector<32x128xf32>, vector<8x128xf32> -> vector<8x128xf32>
    %274 = vector.broadcast %14 : vector<1x128xf32> to vector<8x128xf32>
    %275 = arith.addf %273, %274 : vector<8x128xf32>
    %cst_71 = arith.constant dense<0.000000e+00> : vector<8x128xf32>
    %276 = tpu.matmul %254, %12, %cst_71 {dimension_numbers = #tpu.dot_dimension_numbers<[1], [0], [0], [1], [0, 0, 1, 1], [], []>} : vector<8x32xf32>, vector<32x128xf32>, vector<8x128xf32> -> vector<8x128xf32>
    %277 = arith.addf %275, %276 : vector<8x128xf32>
    %278 = arith.negf %277 : vector<8x128xf32>
    %279 = math.exp %278 : vector<8x128xf32>
    %cst_72 = arith.constant 1.000000e+00 : f32
    %280 = vector.broadcast %cst_72 : f32 to vector<8x128xf32>
    %281 = arith.addf %280, %279 : vector<8x128xf32>
    %282 = arith.divf %280, %281 : vector<8x128xf32>
    %283 = vector.extract_strided_slice %282 {offsets = [0, 0], sizes = [8, 32], strides = [1, 1]} : vector<8x128xf32> to vector<8x32xf32>
    %284 = vector.extract_strided_slice %282 {offsets = [0, 32], sizes = [8, 32], strides = [1, 1]} : vector<8x128xf32> to vector<8x32xf32>
    %285 = vector.extract_strided_slice %282 {offsets = [0, 96], sizes = [8, 32], strides = [1, 1]} : vector<8x128xf32> to vector<8x32xf32>
    %286 = vector.extract_strided_slice %277 {offsets = [0, 64], sizes = [8, 32], strides = [1, 1]} : vector<8x128xf32> to vector<8x32xf32>
    %287 = math.tanh %286 : vector<8x32xf32>
    %288 = arith.mulf %284, %252 : vector<8x32xf32>
    %289 = arith.mulf %283, %287 : vector<8x32xf32>
    %290 = arith.addf %288, %289 : vector<8x32xf32>
    %291 = math.tanh %290 : vector<8x32xf32>
    %292 = arith.mulf %285, %291 : vector<8x32xf32>
    %c56 = arith.constant 56 : index
    %c0_73 = arith.constant 0 : index
    %293 = vector.load %arg16[%c56, %c0_73] : memref<64x128xf32, #tpu.memory_space<vmem>>, vector<8x128xf32>
    %cst_74 = arith.constant dense<0.000000e+00> : vector<8x128xf32>
    %294 = tpu.matmul %272, %11, %cst_74 {dimension_numbers = #tpu.dot_dimension_numbers<[1], [0], [0], [1], [0, 0, 1, 1], [], []>} : vector<8x32xf32>, vector<32x128xf32>, vector<8x128xf32> -> vector<8x128xf32>
    %295 = arith.addf %293, %294 : vector<8x128xf32>
    %296 = arith.negf %295 : vector<8x128xf32>
    %297 = math.exp %296 : vector<8x128xf32>
    %cst_75 = arith.constant 1.000000e+00 : f32
    %298 = vector.broadcast %cst_75 : f32 to vector<8x128xf32>
    %299 = arith.addf %298, %297 : vector<8x128xf32>
    %300 = arith.divf %298, %299 : vector<8x128xf32>
    %301 = vector.extract_strided_slice %300 {offsets = [0, 0], sizes = [8, 32], strides = [1, 1]} : vector<8x128xf32> to vector<8x32xf32>
    %302 = vector.extract_strided_slice %300 {offsets = [0, 32], sizes = [8, 32], strides = [1, 1]} : vector<8x128xf32> to vector<8x32xf32>
    %303 = vector.extract_strided_slice %300 {offsets = [0, 96], sizes = [8, 32], strides = [1, 1]} : vector<8x128xf32> to vector<8x32xf32>
    %304 = vector.extract_strided_slice %295 {offsets = [0, 64], sizes = [8, 32], strides = [1, 1]} : vector<8x128xf32> to vector<8x32xf32>
    %305 = math.tanh %304 : vector<8x32xf32>
    %306 = arith.mulf %302, %270 : vector<8x32xf32>
    %307 = arith.mulf %301, %305 : vector<8x32xf32>
    %308 = arith.addf %306, %307 : vector<8x32xf32>
    %309 = math.tanh %308 : vector<8x32xf32>
    %310 = arith.mulf %303, %309 : vector<8x32xf32>
    %cst_76 = arith.constant dense<0.000000e+00> : vector<8x128xf32>
    %311 = tpu.matmul %310, %10, %cst_76 {dimension_numbers = #tpu.dot_dimension_numbers<[1], [0], [0], [1], [0, 0, 1, 1], [], []>} : vector<8x32xf32>, vector<32x128xf32>, vector<8x128xf32> -> vector<8x128xf32>
    %312 = vector.broadcast %14 : vector<1x128xf32> to vector<8x128xf32>
    %313 = arith.addf %311, %312 : vector<8x128xf32>
    %cst_77 = arith.constant dense<0.000000e+00> : vector<8x128xf32>
    %314 = tpu.matmul %292, %12, %cst_77 {dimension_numbers = #tpu.dot_dimension_numbers<[1], [0], [0], [1], [0, 0, 1, 1], [], []>} : vector<8x32xf32>, vector<32x128xf32>, vector<8x128xf32> -> vector<8x128xf32>
    %315 = arith.addf %313, %314 : vector<8x128xf32>
    %316 = arith.negf %315 : vector<8x128xf32>
    %317 = math.exp %316 : vector<8x128xf32>
    %cst_78 = arith.constant 1.000000e+00 : f32
    %318 = vector.broadcast %cst_78 : f32 to vector<8x128xf32>
    %319 = arith.addf %318, %317 : vector<8x128xf32>
    %320 = arith.divf %318, %319 : vector<8x128xf32>
    %321 = vector.extract_strided_slice %320 {offsets = [0, 0], sizes = [8, 32], strides = [1, 1]} : vector<8x128xf32> to vector<8x32xf32>
    %322 = vector.extract_strided_slice %320 {offsets = [0, 32], sizes = [8, 32], strides = [1, 1]} : vector<8x128xf32> to vector<8x32xf32>
    %323 = vector.extract_strided_slice %320 {offsets = [0, 96], sizes = [8, 32], strides = [1, 1]} : vector<8x128xf32> to vector<8x32xf32>
    %324 = vector.extract_strided_slice %315 {offsets = [0, 64], sizes = [8, 32], strides = [1, 1]} : vector<8x128xf32> to vector<8x32xf32>
    %325 = math.tanh %324 : vector<8x32xf32>
    %326 = arith.mulf %322, %290 : vector<8x32xf32>
    %327 = arith.mulf %321, %325 : vector<8x32xf32>
    %328 = arith.addf %326, %327 : vector<8x32xf32>
    %329 = math.tanh %328 : vector<8x32xf32>
    %330 = arith.mulf %323, %329 : vector<8x32xf32>
    %c0_79 = arith.constant 0 : index
    %c0_80 = arith.constant 0 : index
    %c0_81 = arith.constant 0 : index
    %331 = vector.load %arg14[%c0_79, %c0_80, %c0_81] : memref<2x8x32xf32, #tpu.memory_space<vmem>>, vector<1x8x32xf32>
    %332 = vector.shape_cast %331 : vector<1x8x32xf32> to vector<8x32xf32>
    %333 = vector.shape_cast %310 : vector<8x32xf32> to vector<1x8x32xf32>
    tpu.vector_store %arg14[%c0_79, %c0_80, %c0_81], %333 {strides = array<i32>} : memref<2x8x32xf32, #tpu.memory_space<vmem>>, vector<1x8x32xf32>,
    %c0_82 = arith.constant 0 : index
    %c0_83 = arith.constant 0 : index
    %c0_84 = arith.constant 0 : index
    %334 = vector.load %arg15[%c0_82, %c0_83, %c0_84] : memref<2x8x32xf32, #tpu.memory_space<vmem>>, vector<1x8x32xf32>
    %335 = vector.shape_cast %334 : vector<1x8x32xf32> to vector<8x32xf32>
    %336 = vector.shape_cast %308 : vector<8x32xf32> to vector<1x8x32xf32>
    tpu.vector_store %arg15[%c0_82, %c0_83, %c0_84], %336 {strides = array<i32>} : memref<2x8x32xf32, #tpu.memory_space<vmem>>, vector<1x8x32xf32>,
    %c1_85 = arith.constant 1 : index
    %c0_86 = arith.constant 0 : index
    %c0_87 = arith.constant 0 : index
    %337 = vector.load %arg14[%c1_85, %c0_86, %c0_87] : memref<2x8x32xf32, #tpu.memory_space<vmem>>, vector<1x8x32xf32>
    %338 = vector.shape_cast %337 : vector<1x8x32xf32> to vector<8x32xf32>
    %339 = vector.shape_cast %330 : vector<8x32xf32> to vector<1x8x32xf32>
    tpu.vector_store %arg14[%c1_85, %c0_86, %c0_87], %339 {strides = array<i32>} : memref<2x8x32xf32, #tpu.memory_space<vmem>>, vector<1x8x32xf32>,
    %c1_88 = arith.constant 1 : index
    %c0_89 = arith.constant 0 : index
    %c0_90 = arith.constant 0 : index
    %340 = vector.load %arg15[%c1_88, %c0_89, %c0_90] : memref<2x8x32xf32, #tpu.memory_space<vmem>>, vector<1x8x32xf32>
    %341 = vector.shape_cast %340 : vector<1x8x32xf32> to vector<8x32xf32>
    %342 = vector.shape_cast %328 : vector<8x32xf32> to vector<1x8x32xf32>
    tpu.vector_store %arg15[%c1_88, %c0_89, %c0_90], %342 {strides = array<i32>} : memref<2x8x32xf32, #tpu.memory_space<vmem>>, vector<1x8x32xf32>,
    %c0_91 = arith.constant 0 : index
    %c0_92 = arith.constant 0 : index
    %343 = vector.load %arg11[%c0_91, %c0_92] : memref<1x32xf32, #tpu.memory_space<vmem>>, vector<1x32xf32>
    %c0_93 = arith.constant 0 : index
    %c0_94 = arith.constant 0 : index
    %344 = vector.load %arg12[%c0_93, %c0_94] : memref<1x1xf32, #tpu.memory_space<vmem>>, vector<1x1xf32>
    %345 = vector.broadcast %343 : vector<1x32xf32> to vector<8x32xf32>
    %346 = arith.mulf %330, %345 : vector<8x32xf32>
    %cst_95 = arith.constant dense<0.000000e+00> : vector<8xf32>
    %347 = vector.multi_reduction <add>, %346, %cst_95 [1] : vector<8x32xf32> to vector<8xf32>
    %348 = vector.shape_cast %347 : vector<8xf32> to vector<8x1xf32>
    %349 = vector.broadcast %344 : vector<1x1xf32> to vector<8x1xf32>
    %350 = arith.addf %348, %349 : vector<8x1xf32>
    %351 = arith.negf %350 : vector<8x1xf32>
    %352 = math.exp %351 : vector<8x1xf32>
    %cst_96 = arith.constant 1.000000e+00 : f32
    %353 = vector.broadcast %cst_96 : f32 to vector<8x1xf32>
    %354 = arith.addf %353, %352 : vector<8x1xf32>
    %355 = arith.divf %353, %354 : vector<8x1xf32>
    %c0_97 = arith.constant 0 : index
    %c0_98 = arith.constant 0 : index
    %356 = vector.load %arg13[%c0_97, %c0_98] : memref<8x1xf32, #tpu.memory_space<vmem>>, vector<8x1xf32>
    tpu.vector_store %arg13[%c0_97, %c0_98], %355 {strides = array<i32>} : memref<8x1xf32, #tpu.memory_space<vmem>>, vector<8x1xf32>,
    return
  }
  func.func @transform_0(%arg0: i32) -> (i32, i32, i32) {
    %c0_i32 = arith.constant 0 : i32
    %c0_i32_0 = arith.constant 0 : i32
    %c0_i32_1 = arith.constant 0 : i32
    return %arg0, %c0_i32, %c0_i32_0 : i32, i32, i32
  }
  func.func @transform_1(%arg0: i32) -> (i32, i32) {
    %c0_i32 = arith.constant 0 : i32
    %c0_i32_0 = arith.constant 0 : i32
    %c0_i32_1 = arith.constant 0 : i32
    return %c0_i32, %c0_i32_0 : i32, i32
  }
  func.func @transform_2(%arg0: i32) -> (i32, i32) {
    %c0_i32 = arith.constant 0 : i32
    %c0_i32_0 = arith.constant 0 : i32
    %c0_i32_1 = arith.constant 0 : i32
    return %c0_i32, %c0_i32_0 : i32, i32
  }
  func.func @transform_3(%arg0: i32) -> (i32, i32) {
    %c0_i32 = arith.constant 0 : i32
    %c0_i32_0 = arith.constant 0 : i32
    %c0_i32_1 = arith.constant 0 : i32
    return %c0_i32, %c0_i32_0 : i32, i32
  }
  func.func @transform_4(%arg0: i32) -> (i32, i32) {
    %c0_i32 = arith.constant 0 : i32
    %c0_i32_0 = arith.constant 0 : i32
    %c0_i32_1 = arith.constant 0 : i32
    return %c0_i32, %c0_i32_0 : i32, i32
  }
  func.func @transform_5(%arg0: i32) -> (i32, i32) {
    %c0_i32 = arith.constant 0 : i32
    %c0_i32_0 = arith.constant 0 : i32
    %c0_i32_1 = arith.constant 0 : i32
    return %c0_i32, %c0_i32_0 : i32, i32
  }
  func.func @transform_6(%arg0: i32) -> (i32, i32) {
    %c0_i32 = arith.constant 0 : i32
    %c0_i32_0 = arith.constant 0 : i32
    %c0_i32_1 = arith.constant 0 : i32
    return %c0_i32, %c0_i32_0 : i32, i32
  }
  func.func @transform_7(%arg0: i32) -> (i32, i32) {
    %c0_i32 = arith.constant 0 : i32
    %c0_i32_0 = arith.constant 0 : i32
    %c0_i32_1 = arith.constant 0 : i32
    return %c0_i32, %c0_i32_0 : i32, i32
  }
  func.func @transform_8(%arg0: i32) -> (i32, i32, i32) {
    %c0_i32 = arith.constant 0 : i32
    %c0_i32_0 = arith.constant 0 : i32
    %c0_i32_1 = arith.constant 0 : i32
    return %c0_i32, %arg0, %c0_i32_0 : i32, i32, i32
  }
  func.func @transform_9(%arg0: i32) -> (i32, i32, i32) {
    %c0_i32 = arith.constant 0 : i32
    %c0_i32_0 = arith.constant 0 : i32
    %c0_i32_1 = arith.constant 0 : i32
    return %c0_i32, %arg0, %c0_i32_0 : i32, i32, i32
  }
  func.func @transform_10(%arg0: i32) -> (i32, i32) {
    %c0_i32 = arith.constant 0 : i32
    %c0_i32_0 = arith.constant 0 : i32
    %c0_i32_1 = arith.constant 0 : i32
    return %c0_i32, %c0_i32_0 : i32, i32
  }
  func.func @transform_11(%arg0: i32) -> (i32, i32) {
    %c0_i32 = arith.constant 0 : i32
    %c0_i32_0 = arith.constant 0 : i32
    %c0_i32_1 = arith.constant 0 : i32
    return %c0_i32, %c0_i32_0 : i32, i32
  }
  func.func @transform_12(%arg0: i32) -> (i32, i32) {
    %c0_i32 = arith.constant 0 : i32
    %c0_i32_0 = arith.constant 0 : i32
    return %arg0, %c0_i32 : i32, i32
  }
  func.func @transform_13(%arg0: i32) -> (i32, i32, i32) {
    %c0_i32 = arith.constant 0 : i32
    %c0_i32_0 = arith.constant 0 : i32
    %c0_i32_1 = arith.constant 0 : i32
    return %c0_i32, %arg0, %c0_i32_0 : i32, i32, i32
  }
  func.func @transform_14(%arg0: i32) -> (i32, i32, i32) {
    %c0_i32 = arith.constant 0 : i32
    %c0_i32_0 = arith.constant 0 : i32
    %c0_i32_1 = arith.constant 0 : i32
    return %c0_i32, %arg0, %c0_i32_0 : i32, i32, i32
  }
}

</mosaic_0001>

<bundles_post_ra>
// kernel: sentiment_net_forward.1
= control target key start
LH: loop header
LB: loop body
LE: loop exit
PB: predicated region body
PF: predicated region fallthrough
CT: control target
= control target key end

     0   :  { %v3547_v0 = vmov 0   ;;  %v54_v39 = vlaneseq  ;;  %v3548_v43 = vmov 1.0   ;;  %v3549_v50 = vmov 0.0|0.0   ;;  %s3552_s27 = smov 32   ;;  %s3554_s17 = smov 96   ;;  %s4124_s0 = inlined_call_operand.vmem [shape: s32[1,64,1], index: 0, kind: input, shape index: {}]   ;;  %s4125_s1 = inlined_call_operand.vmem [shape: f32[128,32], index: 1, kind: input, shape index: {}]   ;;  %s4126_s2 = inlined_call_operand.vmem [shape: f32[32,128], index: 2, kind: input, shape index: {}]   ;;  %s4127_s3 = inlined_call_operand.vmem [shape: f32[32,128], index: 3, kind: input, shape index: {}]   ;;  %s4128_s9 = inlined_call_operand.vmem [shape: f32[2,8,32], index: 9, kind: input, shape index: {}]   ;;  %s4129_s8 = inlined_call_operand.vmem [shape: f32[2,8,32], index: 8, kind: input, shape index: {}]   ;;  %s4130_s4 = inlined_call_operand.vmem [shape: f32[1,128], index: 4, kind: input, shape index: {}]   ;;  %s4131_s5 = inlined_call_operand.vmem [shape: f32[32,128], index: 5, kind: input, shape index: {}]   ;;  %s4132_s6 = inlined_call_operand.vmem [shape: f32[32,128], index: 6, kind: input, shape index: {}]   ;;  %s4133_s7 = inlined_call_operand.vmem [shape: f32[1,128], index: 7, kind: input, shape index: {}]   ;;  %s4134_s13 = inlined_call_operand.vmem [shape: f32[2,8,32], index: 13, kind: output, shape index: {1}]   ;;  %s4135_s10 = inlined_call_operand.vmem [shape: f32[1,32], index: 10, kind: input, shape index: {}]   ;;  %s4136_s11 = inlined_call_operand.<no memory space> [shape: f32[1,1], index: 11, kind: input, shape index: {}]   ;;  %s4137_s14 = inlined_call_operand.vmem [shape: f32[2,8,32], index: 14, kind: output, shape index: {2}]   ;;  %s4138_s12 = inlined_call_operand.vmem [shape: f32[8,1], index: 12, kind: output, shape index: {0}]  }
   0x1   :  { %3414 = vset.pattern.permute.xlu1 %v3547_v0  ;;  %3413 = vset.pattern.permute.xlu0 %v3547_v0  ;;  %v48_v1 = vld [vmem:[%s4124_s0 + $0x10] sm:$0xff]  ;;  %v46_v2 = vld [vmem:[%s4124_s0] sm:$0xff]  ;;  %v49_v3 = vld [vmem:[%s4124_s0 + $0x18] sm:$0xff]  ;;  %vm3550_vm8 = vmmov 0   ;;  %v3551_v57 = vmov 0.0   ;;  %vm249_vm9 = vcmask 261120  }
   0x2   :  { %63 = vperm.xlu1 %3414, %v48_v1   ;;  %57 = vperm.xlu0 %3413, %v46_v2   ;;  %v47_v4 = vld [vmem:[%s4124_s0 + $0x8] sm:$0xff]  ;;  %v104_v5 = vld [vmem:[%s4125_s1] sm:$0xff]  ;;  %v106_v7 = vld [vmem:[%s4125_s1 + $0x10] sm:$0xff]  ;;  %v55_v40 = vand.u32 127, %v54_v39  ;;  %vm2626_vm10 = vcmask 7168  }
   0x3   :  { %v105_v6 = vld [vmem:[%s4125_s1 + $0x8] sm:$0xff]  ;;  %v107_v8 = vld [vmem:[%s4125_s1 + $0x18] sm:$0xff]  ;;  %v108_v11 = vld [vmem:[%s4125_s1 + $0x20] sm:$0xff] }
   0x4   :  { %v3197_v9 = vpack.c.bf16 %v105_v6, %v104_v5  ;;  %v3201_v10 = vpack.c.bf16 %v107_v8, %v106_v7  ;;  %v109_v12 = vld [vmem:[%s4125_s1 + $0x28] sm:$0xff]  ;;  %v50_v14 = vld [vmem:[%s4124_s0 + $0x20] sm:$0xff]  ;;  %v110_v16 = vld [vmem:[%s4125_s1 + $0x30] sm:$0xff] }
   0x5   :  { %v51_v13 = vld [vmem:[%s4124_s0 + $0x28] sm:$0xff]  ;;  %v3205_v15 = vpack.c.bf16 %v109_v12, %v108_v11  ;;  %v111_v17 = vld [vmem:[%s4125_s1 + $0x38] sm:$0xff]  ;;  %v52_v19 = vld [vmem:[%s4124_s0 + $0x30] sm:$0xff] }
   0x6   :  { %66 = vperm.xlu1 %3414, %v49_v3   ;;  %60 = vperm.xlu0 %3413, %v47_v4   ;;  %v53_v18 = vld [vmem:[%s4124_s0 + $0x38] sm:$0xff]  ;;  %v3209_v20 = vpack.c.bf16 %v111_v17, %v110_v16  ;;  %v112_v21 = vld [vmem:[%s4125_s1 + $0x40] sm:$0xff]  ;;  %v113_v22 = vld [vmem:[%s4125_s1 + $0x48] sm:$0xff] }
   0x7   :  { %3198 = vmatprep.subr.bf16.mxu0 %v3197_v9  ;;  %v3213_v23 = vpack.c.bf16 %v113_v22, %v112_v21  ;;  %v114_v24 = vld [vmem:[%s4125_s1 + $0x50] sm:$0xff]  ;;  %v115_v25 = vld [vmem:[%s4125_s1 + $0x58] sm:$0xff]  ;;  %v225_v26 = vld [vmem:[%s4126_s2] sm:$0xff] }
   0x8   :  { %3200 = vmatpush3.bf16.msra.mxu0 %v3197_v9  ;;  %v226_v27 = vld [vmem:[%s4126_s2 + $0x8] sm:$0xff]  ;;  %v227_v28 = vld [vmem:[%s4126_s2 + $0x10] sm:$0xff]  ;;  %v3217_v29 = vpack.c.bf16 %v115_v25, %v114_v24  ;;  %v228_v31 = vld [vmem:[%s4126_s2 + $0x18] sm:$0xff] }
   0x9   :  { %3202 = vmatprep.subr.bf16.mxu0 %v3201_v10  ;;  %v3229_v30 = vpack.c.bf16 %v226_v27, %v225_v26  ;;  %v116_v32 = vld [vmem:[%s4125_s1 + $0x60] sm:$0xff]  ;;  %v117_v33 = vld [vmem:[%s4125_s1 + $0x68] sm:$0xff]  ;;  %v3233_v34 = vpack.c.bf16 %v228_v31, %v227_v28  ;;  %v118_v36 = vld [vmem:[%s4125_s1 + $0x70] sm:$0xff] }
   0xa   :  { %72 = vperm.xlu1 %3414, %v51_v13   ;;  %69 = vperm.xlu0 %3413, %v50_v14   ;;  %v3221_v35 = vpack.c.bf16 %v117_v33, %v116_v32  ;;  %v119_v37 = vld [vmem:[%s4125_s1 + $0x78] sm:$0xff]  ;;  %v233_v51 = vld [vmem:[%s4127_s3] sm:$0xff]  ;;  %v234_v52 = vld [vmem:[%s4127_s3 + $0x8] sm:$0xff] }
   0xb   :  { %3230 = vmatprep.subr.bf16.mxu1 %v3229_v30  ;;  %v3225_v38 = vpack.c.bf16 %v119_v37, %v118_v36  ;;  %v3722_v53 = vpack.c.bf16 %v234_v52, %v233_v51  ;;  %v235_v54 = vld [vmem:[%s4127_s3 + $0x10] sm:$0xff]  ;;  %v236_v55 = vld [vmem:[%s4127_s3 + $0x18] sm:$0xff]  ;;  %v390_v58 = vld [vmem:[%s4128_s9] sm:$0xff] }
   0xc   :  { %3204 = vmatpush3.bf16.msra.mxu0 %v3201_v10  ;;  %3232 = vmatpush3.bf16.msra.mxu1 %v3229_v30  ;;  %v3732_v56 = vpack.c.bf16 %v236_v55, %v235_v54  ;;  %v387_v3 = vld [vmem:[%s4129_s8] sm:$0xff]  ;;  %v230_v36 = vld [vmem:[%s4131_s5 + $0x8] sm:$0xff]  ;;  %v231_v37 = vld [vmem:[%s4131_s5 + $0x10] sm:$0xff] }
   0xd   :  { %3206 = vmatprep.subr.bf16.mxu0 %v3205_v15  ;;  %3234 = vmatprep.subr.bf16.mxu1 %v3233_v34  ;;  %v2656_v4 = vld [vmem:[%s4130_s4] ss:$0 sm:$0xff]  ;;  %s3553_s4 = smov 64   ;;  %v232_v39 = vld [vmem:[%s4131_s5 + $0x18] sm:$0xff]  ;;  %v2665_v52 = vld [vmem:[%s4129_s8 + $0x8] sm:$0xff] }
   0xe   :  { %78 = vperm.xlu1 %3414, %v53_v18   ;;  %75 = vperm.xlu0 %3413, %v52_v19  }
  0x10   :  { %3208 = vmatpush3.bf16.msra.mxu0 %v3205_v15  ;;  %3236 = vmatpush3.bf16.msra.mxu1 %v3233_v34 }
  0x11   :  { %3210 = vmatprep.subr.bf16.mxu0 %v3209_v20  ;;  %3237 = vmatprep.subr.bf16.mxu1 %v3549_v50 }
  0x12   :  { %476 = vrot.lane.b32.xlu1 %v390_v58, %s3552_s27 }
  0x14   :  { %3212 = vmatpush3.bf16.msra.mxu0 %v3209_v20 }
  0x15   :  { %3214 = vmatprep.subr.bf16.mxu0 %v3213_v23 }
  0x18   :  { %3216 = vmatpush3.bf16.msra.mxu0 %v3213_v23 }
  0x19   :  { %3218 = vmatprep.subr.bf16.mxu0 %v3217_v29 }
  0x1c   :  { %3220 = vmatpush3.bf16.msra.mxu0 %v3217_v29 }
  0x1d   :  { %3222 = vmatprep.subr.bf16.mxu0 %v3221_v35 }
  0x20   :  { %3224 = vmatpush3.bf16.msra.mxu0 %v3221_v35  ;;  %v229_v35 = vld [vmem:[%s4131_s5] sm:$0xff] }
  0x21   :  { %3226 = vmatprep.subr.bf16.mxu0 %v3225_v38 }
  0x24   :  { %3228 = vmatpush3.bf16.msra.mxu0 %v3225_v38  ;;  %v3793_v38 = vpack.c.bf16 %v230_v36, %v229_v35 }
  0x25   :  { %3255 = vmatprep.subr.bf16.mxu0 %v3549_v50 }
  0x81   :  { %v64_v41 = vpop.permute.xlu1 %63  ;;  %v58_v42 = vpop.permute.xlu0 %57 }
  0x82   :  { %vm80_vm0 = vcmp.eq.s32.totalorder %v55_v40, %v58_v42  ;;  %vm82_vm1 = vcmp.eq.s32.totalorder %v55_v40, %v64_v41 }
  0x83   :  { %2901 = vmatprep.mubr.msk.f32.mxu0 %vm80_vm0, %v3548_v43 }
  0x85   :  { %v67_v44 = vpop.permute.xlu1 %66  ;;  %v61_v45 = vpop.permute.xlu0 %60 }
  0x86   :  { %vm81_vm2 = vcmp.eq.s32.totalorder %v55_v40, %v61_v45  ;;  %vm83_vm3 = vcmp.eq.s32.totalorder %v55_v40, %v67_v44  ;;  %v237_v44 = vld [vmem:[%s4132_s6] sm:$0xff]  ;;  %v238_v45 = vld [vmem:[%s4132_s6 + $0x8] sm:$0xff] }
  0x87   :  { %2902 = vmatmul.mubr.msk.f32.vlgmr.msra.gmra.mrb[0].mxu0 %vm81_vm2, %v3548_v43 }
  0x88   :  { %2904 = vmatprep.mubr.msk.f32.mxu0 %vm82_vm1, %v3548_v43  ;;  %3257 = vmatpush3.bf16.msra.mxu0 %v3722_v53 }
  0x89   :  { %v73_v46 = vpop.permute.xlu1 %72  ;;  %v70_v47 = vpop.permute.xlu0 %69  ;;  %3258 = vmatprep.subr.bf16.mxu0 %v3549_v50 }
  0x8a   :  { %vm84_vm4 = vcmp.eq.s32.totalorder %v55_v40, %v70_v47  ;;  %vm85_vm5 = vcmp.eq.s32.totalorder %v55_v40, %v73_v46  ;;  %v3812_v46 = vpack.c.bf16 %v238_v45, %v237_v44  ;;  %v239_v47 = vld [vmem:[%s4132_s6 + $0x10] sm:$0xff] }
  0x8b   :  { %2905 = vmatmul.mubr.msk.f32.gmra.mrb[2].mxu0 %vm83_vm3, %v3548_v43 }
  0x8c   :  { %2907 = vmatprep.mubr.msk.f32.mxu0 %vm84_vm4, %v3548_v43  ;;  %3260 = vmatpush3.bf16.msra.mxu0 %v3732_v56 }
  0x8d   :  { %v76_v48 = vpop.permute.xlu0 %75  ;;  %v79_v49 = vpop.permute.xlu1 %78  ;;  %3273 = vmatprep.subr.bf16.mxu0 %v3549_v50 }
  0x8e   :  { %vm86_vm6 = vcmp.eq.s32.totalorder %v55_v40, %v76_v48  ;;  %vm87_vm7 = vcmp.eq.s32.totalorder %v55_v40, %v79_v49  ;;  %v3799_v40 = vpack.c.bf16 %v232_v39, %v231_v37  ;;  %v240_v48 = vld [vmem:[%s4132_s6 + $0x18] sm:$0xff] }
  0x8f   :  { %2908 = vmatmul.mubr.msk.f32.gmra.mrb[4].mxu0 %vm85_vm5, %v3548_v43  ;;  %v3823_v51 = vpack.c.bf16 %v240_v48, %v239_v47 }
  0x90   :  { %2910 = vmatprep.mubr.msk.f32.mxu0 %vm86_vm6, %v3548_v43 }
  0x91   :  { %v477_v31 = vpop.permute.xlu1 %476 }
  0x93   :  { %2911 = vmatmul.mubr.msk.f32.gmra.mrb[6].mxu0 %vm87_vm7, %v3548_v43 }
  0x94   :  { %2974 = vmatprep.mubr.msk.f32.mxu0 %vm3550_vm8, %v3551_v57 }
 0x15a   :  { %v2903_v59 = vpop.f32.mrb[0].mxu0 }
 0x15b   :  { %v186_v60 = vpop.f32.mrb[1].mxu0 }
 0x15c   :  { %2921 = vmatprep.mubr.msk.f32.mxu1 %vm249_vm9, %v186_v60 }
 0x15d   :  { %2922 = vmatmul.mubr.msk.f32.vlgmr.msra.gmra.mrb[0].mxu1 %vm249_vm9, %v2903_v59  ;;  %v3850_v59 = vld [vmem:[%s4133_s7] ss:$0 sm:$0xff] }
 0x15e   :  { %3239 = vmatpush3.bf16.msra.mxu1 %v3722_v53  ;;  %v2906_v61 = vpop.f32.mrb[2].mxu0 }
 0x15f   :  { %v196_v62 = vpop.f32.mrb[3].mxu0  ;;  %3240 = vmatprep.subr.bf16.mxu1 %v3549_v50 }
 0x160   :  { %2924 = vmatprep.mubr.msk.f32.mxu1 %vm249_vm9, %v196_v62 }
 0x161   :  { %2925 = vmatmul.mubr.msk.f32.gmra.mrb[2].mxu1 %vm249_vm9, %v2906_v61 }
 0x162   :  { %v2909_v63 = vpop.f32.mrb[4].mxu0  ;;  %3242 = vmatpush3.bf16.msra.mxu1 %v3732_v56 }
 0x163   :  { %v206_v0 = vpop.f32.mrb[5].mxu0  ;;  %3243 = vmatprep.subr.bf16.mxu1 %v3549_v50 }
 0x164   :  { %2927 = vmatprep.mubr.msk.f32.mxu1 %vm249_vm9, %v206_v0 }
 0x165   :  { %2928 = vmatmul.mubr.msk.f32.gmra.mrb[4].mxu1 %vm249_vm9, %v2909_v63 }
 0x166   :  { %v2912_v1 = vpop.f32.mrb[6].mxu0 }
 0x167   :  { %v216_v2 = vpop.f32.mrb[7].mxu0 }
 0x168   :  { %2930 = vmatprep.mubr.msk.f32.mxu1 %vm249_vm9, %v216_v2 }
 0x169   :  { %2931 = vmatmul.mubr.msk.f32.gmra.mrb[6].mxu1 %vm249_vm9, %v2912_v1  ;;  %v2666_v1 = vld [vmem:[%s4128_s9 + $0x8] sm:$0xff] }
 0x16a   :  { %2941 = vmatprep.mubr.msk.f32.mxu1 %vm3550_vm8, %v3551_v57 }
 0x16d   :  { %2942 = vmatmul.mubr.msk.f32.vlgmr.msra.gmra.mrb[8].mxu1 %vm249_vm9, %v387_v3 }
 0x16e   :  { %2952 = vmatprep.mubr.msk.f32.mxu1 %vm3550_vm8, %v3551_v57  ;;  %3245 = vmatpush3.bf16.msra.mxu1 %v3793_v38 }
 0x16f   :  { %3246 = vmatprep.subr.bf16.mxu1 %v3549_v50 }
 0x172   :  { %3248 = vmatpush3.bf16.msra.mxu1 %v3799_v40 }
 0x173   :  { %3249 = vmatprep.subr.bf16.mxu1 %v3549_v50 }
 0x230   :  { %v2923_v5 = vpop.f32.mrb[0].mxu1 }
 0x231   :  { %v3765_v6 = vadd.f32 %v2923_v5, %v2656_v4  ;;  %v340_v7 = vpop.f32.mrb[1].mxu1 }
 0x232   :  { %v341_v20 = vadd.f32 %v2656_v4, %v340_v7 }
 0x234   :  { %v2926_v8 = vpop.f32.mrb[2].mxu1 }
 0x235   :  { %v3767_v9 = vadd.f32 %v2926_v8, %v2656_v4  ;;  %v350_v10 = vpop.f32.mrb[3].mxu1 }
 0x236   :  { %v3769_v11 = vadd.f32 %v2656_v4, %v350_v10 }
 0x238   :  { %v2929_v12 = vpop.f32.mrb[4].mxu1 }
 0x239   :  { %v3771_v13 = vadd.f32 %v2929_v12, %v2656_v4  ;;  %v360_v14 = vpop.f32.mrb[5].mxu1 }
 0x23a   :  { %v3773_v15 = vadd.f32 %v2656_v4, %v360_v14 }
 0x23c   :  { %v2932_v16 = vpop.f32.mrb[6].mxu1 }
 0x23d   :  { %v3775_v17 = vadd.f32 %v2932_v16, %v2656_v4  ;;  %v370_v18 = vpop.f32.mrb[7].mxu1 }
 0x23e   :  { %v3777_v19 = vadd.f32 %v2656_v4, %v370_v18 }
 0x240   :  { %v463_v21 = vpop.f32.mrb[8].mxu1 }
 0x241   :  { %v467_v22 = vadd.f32 %v463_v21, %v341_v20  ;;  %v2943_v23 = vpop.f32.mrb[9].mxu1 }
 0x243   :  { %3415 = vtanh.f32 %v467_v22  ;;  %v2668_v25 = vmul.f32 -1.442695, %v467_v22 }
 0x245   :  { %3417 = vpow2.f32 %v2668_v25 }
 0x24d   :  { %v3416_v24 = vpop.eup %3415 }
 0x24e   :  { %481 = vrot.lane.b32.xlu0 %v3416_v24, %s3553_s4 }
 0x24f   :  { %v3418_v26 = vpop.eup %3417 }
 0x250   :  { %v471_v27 = vadd.f32 1.0, %v3418_v26 }
 0x252   :  { %3419 = vrcp.f32 %v471_v27 }
 0x25c   :  { %v3420_v28 = vpop.eup %3419 }
 0x25d   :  { %v479_v32 = vmul.f32 %v3420_v28, %v477_v31 }
 0x2c0   :  { %v482_v29 = vpop.permute.xlu0 %481 }
 0x2c1   :  { %v484_v30 = vmul.f32 %v3420_v28, %v482_v29 }
 0x2c3   :  { %486 = vrot.lane.b32.xlu0 %v484_v30, %s3552_s27 }
 0x335   :  { %v487_v33 = vpop.permute.xlu0 %486 }
 0x336   :  { %v3781_v34 = vadd.f32 %v487_v33, %v479_v32 }
 0x338   :  { %3421 = vtanh.f32 %v3781_v34 }
 0x342   :  { %v3422_v41 = vpop.eup %3421 }
 0x343   :  { %492 = vrot.lane.b32.xlu1 %v3422_v41, %s3553_s4 }
 0x3b5   :  { %v493_v42 = vpop.permute.xlu1 %492 }
 0x3b6   :  { %v495_v43 = vmul.f32 %v3420_v28, %v493_v42 }
 0x3b8   :  { %503 = vrot.lane.b32.xlu0 %v495_v43, %s3552_s27 }
 0x42a   :  { %v504_v49 = vpop.permute.xlu0 %503 }
 0x42b   :  { %2953 = vmatmul.mubr.msk.f32.vlgmr.msra.gmra.mrb[10].mxu1 %vm249_vm9, %v504_v49  ;;  %2975 = vmatmul.mubr.msk.f32.vlgmr.msra.gmra.mrb[8].mxu0 %vm249_vm9, %v504_v49 }
 0x42c   :  { %3251 = vmatpush3.bf16.msra.mxu1 %v3812_v46  ;;  %2963 = vmatprep.mubr.msk.f32.mxu1 %vm3550_vm8, %v3551_v57 }
 0x42d   :  { %3252 = vmatprep.subr.bf16.mxu1 %v3549_v50  ;;  %3275 = vmatpush3.bf16.msra.mxu0 %v3722_v53 }
 0x42e   :  { %3276 = vmatprep.subr.bf16.mxu0 %v3549_v50  ;;  %3007 = vmatprep.mubr.msk.f32.mxu0 %vm3550_vm8, %v3551_v57 }
 0x430   :  { %3254 = vmatpush3.bf16.msra.mxu1 %v3823_v51 }
 0x431   :  { %3261 = vmatprep.subr.bf16.mxu1 %v3549_v50  ;;  %3278 = vmatpush3.bf16.msra.mxu0 %v3732_v56 }
 0x432   :  { %3279 = vmatprep.subr.bf16.mxu0 %v3549_v50 }
 0x433   :  { %2964 = vmatmul.mubr.msk.f32.vlgmr.msra.gmra.mrb[10].mxu1 %vm249_vm9, %v2665_v52 }
 0x434   :  { %3263 = vmatpush3.bf16.msra.mxu1 %v3793_v38  ;;  %2985 = vmatprep.mubr.msk.f32.mxu1 %vm3550_vm8, %v3551_v57 }
 0x435   :  { %3264 = vmatprep.subr.bf16.mxu1 %v3549_v50 }
 0x438   :  { %3266 = vmatpush3.bf16.msra.mxu1 %v3799_v40 }
 0x439   :  { %3267 = vmatprep.subr.bf16.mxu1 %v3549_v50 }
 0x4fe   :  { %v746_v54 = vpop.f32.mrb[8].mxu0 }
 0x4ff   :  { %v750_v55 = vadd.f32 %v746_v54, %v3765_v6  ;;  %v2976_v58 = vpop.f32.mrb[9].mxu0 }
 0x501   :  { %3423 = vtanh.f32 %v750_v55  ;;  %v2674_v2 = vmul.f32 -1.442695, %v750_v55 }
 0x506   :  { %v646_v60 = vpop.f32.mrb[10].mxu1 }
 0x507   :  { %v3381_v61 = vadd.f32 %v3850_v59, %v646_v60  ;;  %v2965_v62 = vpop.f32.mrb[11].mxu1 }
 0x509   :  { %3425 = vtanh.f32 %v3381_v61  ;;  %v2672_v3 = vmul.f32 -1.442695, %v3381_v61 }
 0x50a   :  { %3427 = vpow2.f32 %v2674_v2 }
 0x50b   :  { %v3424_v63 = vpop.eup %3423  ;;  %3429 = vpow2.f32 %v2672_v3 }
 0x50c   :  { %760 = vrot.lane.b32.xlu1 %v3424_v63, %s3553_s4 }
 0x513   :  { %v3426_v0 = vpop.eup %3425 }
 0x514   :  { %664 = vrot.lane.b32.xlu0 %v3426_v0, %s3553_s4  ;;  %v3428_v4 = vpop.eup %3427 }
 0x515   :  { %v754_v5 = vadd.f32 1.0, %v3428_v4  ;;  %v3430_v6 = vpop.eup %3429 }
 0x516   :  { %v654_v7 = vadd.f32 1.0, %v3430_v6 }
 0x517   :  { %3431 = vrcp.f32 %v754_v5 }
 0x518   :  { %659 = vrot.lane.b32.xlu0 %v2666_v1, %s3552_s27  ;;  %3433 = vrcp.f32 %v654_v7 }
 0x521   :  { %v3432_v8 = vpop.eup %3431 }
 0x522   :  { %v3434_v14 = vpop.eup %3433  ;;  %v758_v20 = vmul.f32 %v3432_v8, %v3781_v34 }
 0x57e   :  { %v761_v10 = vpop.permute.xlu1 %760 }
 0x57f   :  { %v763_v12 = vmul.f32 %v3432_v8, %v761_v10 }
 0x581   :  { %765 = vrot.lane.b32.xlu1 %v763_v12, %s3552_s27 }
 0x586   :  { %v665_v16 = vpop.permute.xlu0 %664 }
 0x587   :  { %v667_v18 = vmul.f32 %v3434_v14, %v665_v16 }
 0x589   :  { %669 = vrot.lane.b32.xlu1 %v667_v18, %s3552_s27 }
 0x58a   :  { %v660_v23 = vpop.permute.xlu0 %659 }
 0x58b   :  { %v662_v24 = vmul.f32 %v3434_v14, %v660_v23 }
 0x5f3   :  { %v766_v21 = vpop.permute.xlu1 %765 }
 0x5f4   :  { %v3862_v22 = vadd.f32 %v766_v21, %v758_v20 }
 0x5f6   :  { %3435 = vtanh.f32 %v3862_v22 }
 0x5fb   :  { %v670_v25 = vpop.permute.xlu1 %669 }
 0x5fc   :  { %v3865_v26 = vadd.f32 %v670_v25, %v662_v24 }
 0x5fe   :  { %3437 = vtanh.f32 %v3865_v26 }
 0x600   :  { %v3436_v27 = vpop.eup %3435 }
 0x601   :  { %771 = vrot.lane.b32.xlu0 %v3436_v27, %s3553_s4 }
 0x608   :  { %v3438_v28 = vpop.eup %3437 }
 0x609   :  { %675 = vrot.lane.b32.xlu1 %v3438_v28, %s3553_s4 }
 0x673   :  { %v772_v29 = vpop.permute.xlu0 %771 }
 0x674   :  { %v774_v30 = vmul.f32 %v3432_v8, %v772_v29 }
 0x676   :  { %776 = vrot.lane.b32.xlu0 %v774_v30, %s3552_s27 }
 0x67b   :  { %v676_v31 = vpop.permute.xlu1 %675 }
 0x67c   :  { %v678_v32 = vmul.f32 %v3434_v14, %v676_v31 }
 0x67e   :  { %851 = vrot.lane.b32.xlu1 %v678_v32, %s3552_s27 }
 0x6e8   :  { %v777_v33 = vpop.permute.xlu0 %776 }
 0x6e9   :  { %2986 = vmatmul.mubr.msk.f32.vlgmr.msra.gmra.mrb[12].mxu1 %vm249_vm9, %v777_v33  ;;  %3008 = vmatmul.mubr.msk.f32.vlgmr.msra.gmra.mrb[10].mxu0 %vm249_vm9, %v777_v33 }
 0x6ea   :  { %3269 = vmatpush3.bf16.msra.mxu1 %v3812_v46  ;;  %2996 = vmatprep.mubr.msk.f32.mxu1 %vm3550_vm8, %v3551_v57 }
 0x6eb   :  { %3270 = vmatprep.subr.bf16.mxu1 %v3549_v50  ;;  %3281 = vmatpush3.bf16.msra.mxu0 %v3793_v38 }
 0x6ec   :  { %3282 = vmatprep.subr.bf16.mxu0 %v3549_v50  ;;  %3018 = vmatprep.mubr.msk.f32.mxu0 %vm3550_vm8, %v3551_v57 }
 0x6ee   :  { %3272 = vmatpush3.bf16.msra.mxu1 %v3823_v51 }
 0x6ef   :  { %3291 = vmatprep.subr.bf16.mxu1 %v3549_v50  ;;  %3284 = vmatpush3.bf16.msra.mxu0 %v3799_v40 }
 0x6f0   :  { %v852_v34 = vpop.permute.xlu1 %851  ;;  %3285 = vmatprep.subr.bf16.mxu0 %v3549_v50 }
 0x6f1   :  { %2997 = vmatmul.mubr.msk.f32.vlgmr.msra.gmra.mrb[12].mxu1 %vm249_vm9, %v852_v34 }
 0x6f2   :  { %3293 = vmatpush3.bf16.msra.mxu1 %v3722_v53  ;;  %3040 = vmatprep.mubr.msk.f32.mxu1 %vm3550_vm8, %v3551_v57 }
 0x6f3   :  { %3294 = vmatprep.subr.bf16.mxu1 %v3549_v50 }
 0x6f6   :  { %3296 = vmatpush3.bf16.msra.mxu1 %v3732_v56 }
 0x6f7   :  { %3297 = vmatprep.subr.bf16.mxu1 %v3549_v50 }
 0x7bc   :  { %v1017_v35 = vpop.f32.mrb[10].mxu0 }
 0x7bd   :  { %v1021_v36 = vadd.f32 %v1017_v35, %v3769_v11  ;;  %v3009_v37 = vpop.f32.mrb[11].mxu0 }
 0x7bf   :  { %3439 = vtanh.f32 %v1021_v36  ;;  %v2679_v45 = vmul.f32 -1.442695, %v1021_v36 }
 0x7c4   :  { %v921_v39 = vpop.f32.mrb[12].mxu1 }
 0x7c5   :  { %v3382_v41 = vadd.f32 %v3850_v59, %v921_v39  ;;  %v2998_v42 = vpop.f32.mrb[13].mxu1 }
 0x7c7   :  { %3441 = vtanh.f32 %v3382_v41  ;;  %v2677_v47 = vmul.f32 -1.442695, %v3382_v41 }
 0x7c8   :  { %3443 = vpow2.f32 %v2679_v45 }
 0x7c9   :  { %v3440_v43 = vpop.eup %3439  ;;  %3445 = vpow2.f32 %v2677_v47 }
 0x7ca   :  { %1031 = vrot.lane.b32.xlu0 %v3440_v43, %s3553_s4 }
 0x7d1   :  { %v3442_v44 = vpop.eup %3441 }
 0x7d2   :  { %935 = vrot.lane.b32.xlu1 %v3442_v44, %s3553_s4  ;;  %v3444_v48 = vpop.eup %3443 }
 0x7d3   :  { %v1025_v49 = vadd.f32 1.0, %v3444_v48  ;;  %v3446_v11 = vpop.eup %3445 }
 0x7d4   :  { %v929_v52 = vadd.f32 1.0, %v3446_v11 }
 0x7d5   :  { %3447 = vrcp.f32 %v1025_v49 }
 0x7d6   :  { %3449 = vrcp.f32 %v929_v52 }
 0x7df   :  { %v3448_v54 = vpop.eup %3447 }
 0x7e0   :  { %v3450_v60 = vpop.eup %3449  ;;  %v1029_v63 = vmul.f32 %v3448_v54, %v3862_v22 }
 0x7e1   :  { %v933_v2 = vmul.f32 %v3450_v60, %v3865_v26 }
 0x83c   :  { %v1032_v55 = vpop.permute.xlu0 %1031 }
 0x83d   :  { %v1034_v58 = vmul.f32 %v3448_v54, %v1032_v55 }
 0x83f   :  { %1036 = vrot.lane.b32.xlu0 %v1034_v58, %s3552_s27 }
 0x844   :  { %v936_v61 = vpop.permute.xlu1 %935 }
 0x845   :  { %v938_v62 = vmul.f32 %v3450_v60, %v936_v61 }
 0x847   :  { %940 = vrot.lane.b32.xlu1 %v938_v62, %s3552_s27 }
 0x8b1   :  { %v1037_v0 = vpop.permute.xlu0 %1036 }
 0x8b2   :  { %v3900_v1 = vadd.f32 %v1037_v0, %v1029_v63 }
 0x8b4   :  { %3451 = vtanh.f32 %v3900_v1 }
 0x8b9   :  { %v941_v3 = vpop.permute.xlu1 %940 }
 0x8ba   :  { %v3904_v4 = vadd.f32 %v941_v3, %v933_v2 }
 0x8bc   :  { %3453 = vtanh.f32 %v3904_v4 }
 0x8be   :  { %v3452_v5 = vpop.eup %3451 }
 0x8bf   :  { %1042 = vrot.lane.b32.xlu0 %v3452_v5, %s3553_s4 }
 0x8c6   :  { %v3454_v6 = vpop.eup %3453 }
 0x8c7   :  { %946 = vrot.lane.b32.xlu1 %v3454_v6, %s3553_s4 }
 0x931   :  { %v1043_v7 = vpop.permute.xlu0 %1042 }
 0x932   :  { %v1045_v8 = vmul.f32 %v3448_v54, %v1043_v7 }
 0x934   :  { %1047 = vrot.lane.b32.xlu0 %v1045_v8, %s3552_s27 }
 0x939   :  { %v947_v10 = vpop.permute.xlu1 %946 }
 0x93a   :  { %v949_v12 = vmul.f32 %v3450_v60, %v947_v10 }
 0x93c   :  { %1122 = vrot.lane.b32.xlu1 %v949_v12, %s3552_s27 }
 0x9a6   :  { %v1048_v14 = vpop.permute.xlu0 %1047 }
 0x9a7   :  { %3019 = vmatmul.mubr.msk.f32.vlgmr.msra.gmra.mrb[12].mxu0 %vm249_vm9, %v1048_v14  ;;  %3041 = vmatmul.mubr.msk.f32.vlgmr.msra.gmra.mrb[14].mxu1 %vm249_vm9, %v1048_v14 }
 0x9a8   :  { %3287 = vmatpush3.bf16.msra.mxu0 %v3812_v46  ;;  %3029 = vmatprep.mubr.msk.f32.mxu0 %vm3550_vm8, %v3551_v57 }
 0x9a9   :  { %3288 = vmatprep.subr.bf16.mxu0 %v3549_v50  ;;  %3299 = vmatpush3.bf16.msra.mxu1 %v3793_v38 }
 0x9aa   :  { %3300 = vmatprep.subr.bf16.mxu1 %v3549_v50  ;;  %3051 = vmatprep.mubr.msk.f32.mxu1 %vm3550_vm8, %v3551_v57 }
 0x9ac   :  { %3290 = vmatpush3.bf16.msra.mxu0 %v3823_v51 }
 0x9ad   :  { %3309 = vmatprep.subr.bf16.mxu0 %v3549_v50  ;;  %3302 = vmatpush3.bf16.msra.mxu1 %v3799_v40 }
 0x9ae   :  { %v1123_v16 = vpop.permute.xlu1 %1122  ;;  %3303 = vmatprep.subr.bf16.mxu1 %v3549_v50 }
 0x9af   :  { %3030 = vmatmul.mubr.msk.f32.vlgmr.msra.gmra.mrb[12].mxu0 %vm249_vm9, %v1123_v16 }
 0x9b0   :  { %3311 = vmatpush3.bf16.msra.mxu0 %v3722_v53  ;;  %3073 = vmatprep.mubr.msk.f32.mxu0 %vm3550_vm8, %v3551_v57 }
 0x9b1   :  { %3312 = vmatprep.subr.bf16.mxu0 %v3549_v50 }
 0x9b4   :  { %3314 = vmatpush3.bf16.msra.mxu0 %v3732_v56 }
 0x9b5   :  { %3315 = vmatprep.subr.bf16.mxu0 %v3549_v50 }
 0xa7a   :  { %v1288_v18 = vpop.f32.mrb[14].mxu1 }
 0xa7b   :  { %v1292_v20 = vadd.f32 %v1288_v18, %v3767_v9  ;;  %v3042_v21 = vpop.f32.mrb[15].mxu1 }
 0xa7d   :  { %3455 = vtanh.f32 %v1292_v20  ;;  %v2684_v27 = vmul.f32 -1.442695, %v1292_v20 }
 0xa82   :  { %v1192_v22 = vpop.f32.mrb[12].mxu0 }
 0xa83   :  { %v3383_v23 = vadd.f32 %v3850_v59, %v1192_v22  ;;  %v3031_v24 = vpop.f32.mrb[13].mxu0 }
 0xa85   :  { %3457 = vtanh.f32 %v3383_v23  ;;  %v2682_v28 = vmul.f32 -1.442695, %v3383_v23 }
 0xa86   :  { %3459 = vpow2.f32 %v2684_v27 }
 0xa87   :  { %v3456_v25 = vpop.eup %3455  ;;  %3461 = vpow2.f32 %v2682_v28 }
 0xa88   :  { %1302 = vrot.lane.b32.xlu0 %v3456_v25, %s3553_s4 }
 0xa8f   :  { %v3458_v26 = vpop.eup %3457 }
 0xa90   :  { %1206 = vrot.lane.b32.xlu1 %v3458_v26, %s3553_s4  ;;  %v3460_v29 = vpop.eup %3459 }
 0xa91   :  { %v1296_v30 = vadd.f32 1.0, %v3460_v29  ;;  %v3462_v9 = vpop.eup %3461 }
 0xa92   :  { %v1200_v31 = vadd.f32 1.0, %v3462_v9 }
 0xa93   :  { %3463 = vrcp.f32 %v1296_v30 }
 0xa94   :  { %3465 = vrcp.f32 %v1200_v31 }
 0xa9d   :  { %v3464_v32 = vpop.eup %3463 }
 0xa9e   :  { %v3466_v35 = vpop.eup %3465  ;;  %v1300_v39 = vmul.f32 %v3464_v32, %v3900_v1 }
 0xa9f   :  { %v1204_v43 = vmul.f32 %v3466_v35, %v3904_v4 }
 0xafa   :  { %v1303_v33 = vpop.permute.xlu0 %1302 }
 0xafb   :  { %v1305_v34 = vmul.f32 %v3464_v32, %v1303_v33 }
 0xafd   :  { %1307 = vrot.lane.b32.xlu0 %v1305_v34, %s3552_s27 }
 0xb02   :  { %v1207_v36 = vpop.permute.xlu1 %1206 }
 0xb03   :  { %v1209_v37 = vmul.f32 %v3466_v35, %v1207_v36 }
 0xb05   :  { %1211 = vrot.lane.b32.xlu1 %v1209_v37, %s3552_s27 }
 0xb6f   :  { %v1308_v41 = vpop.permute.xlu0 %1307 }
 0xb70   :  { %v3939_v42 = vadd.f32 %v1308_v41, %v1300_v39 }
 0xb72   :  { %3467 = vtanh.f32 %v3939_v42 }
 0xb77   :  { %v1212_v44 = vpop.permute.xlu1 %1211 }
 0xb78   :  { %v3943_v45 = vadd.f32 %v1212_v44, %v1204_v43 }
 0xb7a   :  { %3469 = vtanh.f32 %v3943_v45 }
 0xb7c   :  { %v3468_v47 = vpop.eup %3467 }
 0xb7d   :  { %1313 = vrot.lane.b32.xlu0 %v3468_v47, %s3553_s4 }
 0xb84   :  { %v3470_v48 = vpop.eup %3469 }
 0xb85   :  { %1217 = vrot.lane.b32.xlu1 %v3470_v48, %s3553_s4 }
 0xbef   :  { %v1314_v49 = vpop.permute.xlu0 %1313 }
 0xbf0   :  { %v1316_v11 = vmul.f32 %v3464_v32, %v1314_v49 }
 0xbf2   :  { %1318 = vrot.lane.b32.xlu0 %v1316_v11, %s3552_s27 }
 0xbf7   :  { %v1218_v52 = vpop.permute.xlu1 %1217 }
 0xbf8   :  { %v1220_v54 = vmul.f32 %v3466_v35, %v1218_v52 }
 0xbfa   :  { %1393 = vrot.lane.b32.xlu1 %v1220_v54, %s3552_s27 }
 0xc64   :  { %v1319_v55 = vpop.permute.xlu0 %1318 }
 0xc65   :  { %3052 = vmatmul.mubr.msk.f32.vlgmr.msra.gmra.mrb[16].mxu1 %vm249_vm9, %v1319_v55  ;;  %3074 = vmatmul.mubr.msk.f32.vlgmr.msra.gmra.mrb[14].mxu0 %vm249_vm9, %v1319_v55 }
 0xc66   :  { %3305 = vmatpush3.bf16.msra.mxu1 %v3812_v46  ;;  %3062 = vmatprep.mubr.msk.f32.mxu1 %vm3550_vm8, %v3551_v57 }
 0xc67   :  { %3306 = vmatprep.subr.bf16.mxu1 %v3549_v50  ;;  %3317 = vmatpush3.bf16.msra.mxu0 %v3793_v38 }
 0xc68   :  { %3318 = vmatprep.subr.bf16.mxu0 %v3549_v50  ;;  %3084 = vmatprep.mubr.msk.f32.mxu0 %vm3550_vm8, %v3551_v57 }
 0xc6a   :  { %3308 = vmatpush3.bf16.msra.mxu1 %v3823_v51 }
 0xc6b   :  { %3327 = vmatprep.subr.bf16.mxu1 %v3549_v50  ;;  %3320 = vmatpush3.bf16.msra.mxu0 %v3799_v40 }
 0xc6c   :  { %v1394_v58 = vpop.permute.xlu1 %1393  ;;  %3321 = vmatprep.subr.bf16.mxu0 %v3549_v50 }
 0xc6d   :  { %3063 = vmatmul.mubr.msk.f32.vlgmr.msra.gmra.mrb[16].mxu1 %vm249_vm9, %v1394_v58 }
 0xc6e   :  { %3329 = vmatpush3.bf16.msra.mxu1 %v3722_v53  ;;  %3106 = vmatprep.mubr.msk.f32.mxu1 %vm3550_vm8, %v3551_v57 }
 0xc6f   :  { %3330 = vmatprep.subr.bf16.mxu1 %v3549_v50 }
 0xc72   :  { %3332 = vmatpush3.bf16.msra.mxu1 %v3732_v56 }
 0xc73   :  { %3333 = vmatprep.subr.bf16.mxu1 %v3549_v50 }
 0xd38   :  { %v1559_v60 = vpop.f32.mrb[14].mxu0 }
 0xd39   :  { %v1563_v61 = vadd.f32 %v1559_v60, %v3773_v15  ;;  %v3075_v62 = vpop.f32.mrb[15].mxu0 }
 0xd3b   :  { %3471 = vtanh.f32 %v1563_v61  ;;  %v2689_v4 = vmul.f32 -1.442695, %v1563_v61 }
 0xd40   :  { %v1463_v63 = vpop.f32.mrb[16].mxu1 }
 0xd41   :  { %v3384_v0 = vadd.f32 %v3850_v59, %v1463_v63  ;;  %v3064_v1 = vpop.f32.mrb[17].mxu1 }
 0xd43   :  { %3473 = vtanh.f32 %v3384_v0  ;;  %v2687_v5 = vmul.f32 -1.442695, %v3384_v0 }
 0xd44   :  { %3475 = vpow2.f32 %v2689_v4 }
 0xd45   :  { %v3472_v2 = vpop.eup %3471  ;;  %3477 = vpow2.f32 %v2687_v5 }
 0xd46   :  { %1573 = vrot.lane.b32.xlu0 %v3472_v2, %s3553_s4 }
 0xd4d   :  { %v3474_v3 = vpop.eup %3473 }
 0xd4e   :  { %1477 = vrot.lane.b32.xlu1 %v3474_v3, %s3553_s4  ;;  %v3476_v6 = vpop.eup %3475 }
 0xd4f   :  { %v1567_v7 = vadd.f32 1.0, %v3476_v6  ;;  %v3478_v15 = vpop.eup %3477 }
 0xd50   :  { %v1471_v8 = vadd.f32 1.0, %v3478_v15 }
 0xd51   :  { %3479 = vrcp.f32 %v1567_v7 }
 0xd52   :  { %3481 = vrcp.f32 %v1471_v8 }
 0xd5b   :  { %v3480_v10 = vpop.eup %3479 }
 0xd5c   :  { %v3482_v16 = vpop.eup %3481  ;;  %v1571_v21 = vmul.f32 %v3480_v10, %v3939_v42 }
 0xd5d   :  { %v1475_v24 = vmul.f32 %v3482_v16, %v3943_v45 }
 0xdb8   :  { %v1574_v12 = vpop.permute.xlu0 %1573 }
 0xdb9   :  { %v1576_v14 = vmul.f32 %v3480_v10, %v1574_v12 }
 0xdbb   :  { %1578 = vrot.lane.b32.xlu0 %v1576_v14, %s3552_s27 }
 0xdc0   :  { %v1478_v18 = vpop.permute.xlu1 %1477 }
 0xdc1   :  { %v1480_v20 = vmul.f32 %v3482_v16, %v1478_v18 }
 0xdc3   :  { %1482 = vrot.lane.b32.xlu1 %v1480_v20, %s3552_s27 }
 0xe2d   :  { %v1579_v22 = vpop.permute.xlu0 %1578 }
 0xe2e   :  { %v3978_v23 = vadd.f32 %v1579_v22, %v1571_v21 }
 0xe30   :  { %3483 = vtanh.f32 %v3978_v23 }
 0xe35   :  { %v1483_v25 = vpop.permute.xlu1 %1482 }
 0xe36   :  { %v3982_v26 = vadd.f32 %v1483_v25, %v1475_v24 }
 0xe38   :  { %3485 = vtanh.f32 %v3982_v26 }
 0xe3a   :  { %v3484_v27 = vpop.eup %3483 }
 0xe3b   :  { %1584 = vrot.lane.b32.xlu0 %v3484_v27, %s3553_s4 }
 0xe42   :  { %v3486_v28 = vpop.eup %3485 }
 0xe43   :  { %1488 = vrot.lane.b32.xlu1 %v3486_v28, %s3553_s4 }
 0xead   :  { %v1585_v29 = vpop.permute.xlu0 %1584 }
 0xeae   :  { %v1587_v30 = vmul.f32 %v3480_v10, %v1585_v29 }
 0xeb0   :  { %1589 = vrot.lane.b32.xlu0 %v1587_v30, %s3552_s27 }
 0xeb5   :  { %v1489_v9 = vpop.permute.xlu1 %1488 }
 0xeb6   :  { %v1491_v31 = vmul.f32 %v3482_v16, %v1489_v9 }
 0xeb8   :  { %1664 = vrot.lane.b32.xlu1 %v1491_v31, %s3552_s27 }
 0xf22   :  { %v1590_v32 = vpop.permute.xlu0 %1589 }
 0xf23   :  { %3085 = vmatmul.mubr.msk.f32.vlgmr.msra.gmra.mrb[16].mxu0 %vm249_vm9, %v1590_v32  ;;  %3107 = vmatmul.mubr.msk.f32.vlgmr.msra.gmra.mrb[18].mxu1 %vm249_vm9, %v1590_v32 }
 0xf24   :  { %3323 = vmatpush3.bf16.msra.mxu0 %v3812_v46  ;;  %3095 = vmatprep.mubr.msk.f32.mxu0 %vm3550_vm8, %v3551_v57 }
 0xf25   :  { %3324 = vmatprep.subr.bf16.mxu0 %v3549_v50  ;;  %3335 = vmatpush3.bf16.msra.mxu1 %v3793_v38 }
 0xf26   :  { %3336 = vmatprep.subr.bf16.mxu1 %v3549_v50  ;;  %3117 = vmatprep.mubr.msk.f32.mxu1 %vm3550_vm8, %v3551_v57 }
 0xf28   :  { %3326 = vmatpush3.bf16.msra.mxu0 %v3823_v51 }
 0xf29   :  { %3345 = vmatprep.subr.bf16.mxu0 %v3549_v50  ;;  %3338 = vmatpush3.bf16.msra.mxu1 %v3799_v40 }
 0xf2a   :  { %v1665_v33 = vpop.permute.xlu1 %1664  ;;  %3339 = vmatprep.subr.bf16.mxu1 %v3549_v50 }
 0xf2b   :  { %3096 = vmatmul.mubr.msk.f32.vlgmr.msra.gmra.mrb[16].mxu0 %vm249_vm9, %v1665_v33 }
 0xf2c   :  { %3347 = vmatpush3.bf16.msra.mxu0 %v3722_v53  ;;  %3139 = vmatprep.mubr.msk.f32.mxu0 %vm3550_vm8, %v3551_v57 }
 0xf2d   :  { %3348 = vmatprep.subr.bf16.mxu0 %v3549_v50 }
 0xf30   :  { %3350 = vmatpush3.bf16.msra.mxu0 %v3732_v56 }
 0xf31   :  { %3351 = vmatprep.subr.bf16.mxu0 %v3549_v50 }
 0xff6   :  { %v1830_v34 = vpop.f32.mrb[18].mxu1 }
 0xff7   :  { %v1834_v35 = vadd.f32 %v1830_v34, %v3771_v13  ;;  %v3108_v36 = vpop.f32.mrb[19].mxu1 }
 0xff9   :  { %3487 = vtanh.f32 %v1834_v35  ;;  %v2694_v44 = vmul.f32 -1.442695, %v1834_v35 }
 0xffe   :  { %v1734_v37 = vpop.f32.mrb[16].mxu0 }
 0xfff   :  { %v3385_v39 = vadd.f32 %v3850_v59, %v1734_v37  ;;  %v3097_v41 = vpop.f32.mrb[17].mxu0 }
0x1001   :  { %3489 = vtanh.f32 %v3385_v39  ;;  %v2692_v45 = vmul.f32 -1.442695, %v3385_v39 }
0x1002   :  { %3491 = vpow2.f32 %v2694_v44 }
0x1003   :  { %v3488_v42 = vpop.eup %3487  ;;  %3493 = vpow2.f32 %v2692_v45 }
0x1004   :  { %1844 = vrot.lane.b32.xlu0 %v3488_v42, %s3553_s4 }
0x100b   :  { %v3490_v43 = vpop.eup %3489 }
0x100c   :  { %1748 = vrot.lane.b32.xlu1 %v3490_v43, %s3553_s4  ;;  %v3492_v47 = vpop.eup %3491 }
0x100d   :  { %v1838_v48 = vadd.f32 1.0, %v3492_v47  ;;  %v3494_v13 = vpop.eup %3493 }
0x100e   :  { %v1742_v49 = vadd.f32 1.0, %v3494_v13 }
0x100f   :  { %3495 = vrcp.f32 %v1838_v48 }
0x1010   :  { %3497 = vrcp.f32 %v1742_v49 }
0x1019   :  { %v3496_v11 = vpop.eup %3495 }
0x101a   :  { %v3498_v55 = vpop.eup %3497  ;;  %v1842_v61 = vmul.f32 %v3496_v11, %v3978_v23 }
0x101b   :  { %v1746_v0 = vmul.f32 %v3498_v55, %v3982_v26 }
0x1076   :  { %v1845_v52 = vpop.permute.xlu0 %1844 }
0x1077   :  { %v1847_v54 = vmul.f32 %v3496_v11, %v1845_v52 }
0x1079   :  { %1849 = vrot.lane.b32.xlu0 %v1847_v54, %s3552_s27 }
0x107e   :  { %v1749_v58 = vpop.permute.xlu1 %1748 }
0x107f   :  { %v1751_v60 = vmul.f32 %v3498_v55, %v1749_v58 }
0x1081   :  { %1753 = vrot.lane.b32.xlu1 %v1751_v60, %s3552_s27 }
0x10eb   :  { %v1850_v62 = vpop.permute.xlu0 %1849 }
0x10ec   :  { %v4017_v63 = vadd.f32 %v1850_v62, %v1842_v61 }
0x10ee   :  { %3499 = vtanh.f32 %v4017_v63 }
0x10f3   :  { %v1754_v1 = vpop.permute.xlu1 %1753 }
0x10f4   :  { %v4021_v2 = vadd.f32 %v1754_v1, %v1746_v0 }
0x10f6   :  { %3501 = vtanh.f32 %v4021_v2 }
0x10f8   :  { %v3500_v3 = vpop.eup %3499 }
0x10f9   :  { %1855 = vrot.lane.b32.xlu0 %v3500_v3, %s3553_s4 }
0x1100   :  { %v3502_v4 = vpop.eup %3501 }
0x1101   :  { %1759 = vrot.lane.b32.xlu1 %v3502_v4, %s3553_s4 }
0x116b   :  { %v1856_v5 = vpop.permute.xlu0 %1855 }
0x116c   :  { %v1858_v6 = vmul.f32 %v3496_v11, %v1856_v5 }
0x116e   :  { %1860 = vrot.lane.b32.xlu0 %v1858_v6, %s3552_s27 }
0x1173   :  { %v1760_v7 = vpop.permute.xlu1 %1759 }
0x1174   :  { %v1762_v15 = vmul.f32 %v3498_v55, %v1760_v7 }
0x1176   :  { %1935 = vrot.lane.b32.xlu1 %v1762_v15, %s3552_s27 }
0x11e0   :  { %v1861_v8 = vpop.permute.xlu0 %1860 }
0x11e1   :  { %3118 = vmatmul.mubr.msk.f32.vlgmr.msra.gmra.mrb[20].mxu1 %vm249_vm9, %v1861_v8  ;;  %3140 = vmatmul.mubr.msk.f32.vlgmr.msra.gmra.mrb[18].mxu0 %vm249_vm9, %v1861_v8 }
0x11e2   :  { %3341 = vmatpush3.bf16.msra.mxu1 %v3812_v46  ;;  %3128 = vmatprep.mubr.msk.f32.mxu1 %vm3550_vm8, %v3551_v57 }
0x11e3   :  { %3342 = vmatprep.subr.bf16.mxu1 %v3549_v50  ;;  %3353 = vmatpush3.bf16.msra.mxu0 %v3793_v38 }
0x11e4   :  { %3354 = vmatprep.subr.bf16.mxu0 %v3549_v50  ;;  %3150 = vmatprep.mubr.msk.f32.mxu0 %vm3550_vm8, %v3551_v57 }
0x11e6   :  { %3344 = vmatpush3.bf16.msra.mxu1 %v3823_v51 }
0x11e7   :  { %3363 = vmatprep.subr.bf16.mxu1 %v3549_v50  ;;  %3356 = vmatpush3.bf16.msra.mxu0 %v3799_v40 }
0x11e8   :  { %v1936_v10 = vpop.permute.xlu1 %1935  ;;  %3357 = vmatprep.subr.bf16.mxu0 %v3549_v50 }
0x11e9   :  { %3129 = vmatmul.mubr.msk.f32.vlgmr.msra.gmra.mrb[20].mxu1 %vm249_vm9, %v1936_v10 }
0x11ea   :  { %3365 = vmatpush3.bf16.msra.mxu1 %v3722_v53  ;;  %3172 = vmatprep.mubr.msk.f32.mxu1 %vm3550_vm8, %v3551_v57 }
0x11eb   :  { %3366 = vmatprep.subr.bf16.mxu1 %v3549_v50 }
0x11ee   :  { %3368 = vmatpush3.bf16.msra.mxu1 %v3732_v56 }
0x11ef   :  { %3369 = vmatprep.subr.bf16.mxu1 %v3549_v50 }
0x12b4   :  { %v2101_v12 = vpop.f32.mrb[18].mxu0 }
0x12b5   :  { %v2105_v14 = vadd.f32 %v2101_v12, %v3777_v19  ;;  %v3141_v16 = vpop.f32.mrb[19].mxu0 }
0x12b7   :  { %3503 = vtanh.f32 %v2105_v14  ;;  %v2699_v23 = vmul.f32 -1.442695, %v2105_v14 }
0x12bc   :  { %v2005_v18 = vpop.f32.mrb[20].mxu1 }
0x12bd   :  { %v3386_v20 = vadd.f32 %v3850_v59, %v2005_v18  ;;  %v3130_v21 = vpop.f32.mrb[21].mxu1 }
0x12bf   :  { %3505 = vtanh.f32 %v3386_v20  ;;  %v2697_v56 = vmul.f32 -1.442695, %v3386_v20 }
0x12c0   :  { %3507 = vpow2.f32 %v2699_v23 }
0x12c1   :  { %v3504_v53 = vpop.eup %3503  ;;  %3509 = vpow2.f32 %v2697_v56 }
0x12c2   :  { %2115 = vrot.lane.b32.xlu0 %v3504_v53, %s3553_s4 }
0x12c9   :  { %v3506_v22 = vpop.eup %3505 }
0x12ca   :  { %2019 = vrot.lane.b32.xlu1 %v3506_v22, %s3553_s4  ;;  %v3508_v24 = vpop.eup %3507 }
0x12cb   :  { %v2109_v25 = vadd.f32 1.0, %v3508_v24  ;;  %v3510_v19 = vpop.eup %3509 }
0x12cc   :  { %v2013_v26 = vadd.f32 1.0, %v3510_v19 }
0x12cd   :  { %3511 = vrcp.f32 %v2109_v25 }
0x12ce   :  { %3513 = vrcp.f32 %v2013_v26 }
0x12d7   :  { %v3512_v27 = vpop.eup %3511 }
0x12d8   :  { %v3514_v30 = vpop.eup %3513  ;;  %v2113_v32 = vmul.f32 %v3512_v27, %v4017_v63 }
0x12d9   :  { %v2017_v35 = vmul.f32 %v3514_v30, %v4021_v2 }
0x1334   :  { %v2116_v28 = vpop.permute.xlu0 %2115 }
0x1335   :  { %v2118_v29 = vmul.f32 %v3512_v27, %v2116_v28 }
0x1337   :  { %2120 = vrot.lane.b32.xlu0 %v2118_v29, %s3552_s27 }
0x133c   :  { %v2020_v9 = vpop.permute.xlu1 %2019 }
0x133d   :  { %v2022_v31 = vmul.f32 %v3514_v30, %v2020_v9 }
0x133f   :  { %2024 = vrot.lane.b32.xlu1 %v2022_v31, %s3552_s27 }
0x13a9   :  { %v2121_v33 = vpop.permute.xlu0 %2120 }
0x13aa   :  { %v2123_v34 = vadd.f32 %v2121_v33, %v2113_v32 }
0x13ac   :  { %3515 = vtanh.f32 %v2123_v34 }
0x13b1   :  { %v2025_v36 = vpop.permute.xlu1 %2024 }
0x13b2   :  { %v2027_v37 = vadd.f32 %v2025_v36, %v2017_v35  ;;  %v20_v35 = vstv %s4136_s11 }
0x13b3   :  { %21 = vst [vmem:[#allocation3] sm:$0x1] %v20_v35 }
0x13b4   :  { %3517 = vtanh.f32 %v2027_v37 }
0x13b6   :  { %v3516_v39 = vpop.eup %3515 }
0x13b7   :  { %2126 = vrot.lane.b32.xlu0 %v3516_v39, %s3553_s4 }
0x13be   :  { %v3518_v41 = vpop.eup %3517 }
0x13bf   :  { %2030 = vrot.lane.b32.xlu1 %v3518_v41, %s3553_s4 }
0x1429   :  { %v2127_v42 = vpop.permute.xlu0 %2126 }
0x142a   :  { %v2129_v43 = vmul.f32 %v3512_v27, %v2127_v42 }
0x142c   :  { %2131 = vrot.lane.b32.xlu0 %v2129_v43, %s3552_s27  ;;  %v2711_v43 = vld [vmem:[#allocation3] ss:$0 sm:$0xff] }
0x1431   :  { %v2031_v44 = vpop.permute.xlu1 %2030 }
0x1432   :  { %v2033_v45 = vmul.f32 %v3514_v30, %v2031_v44 }
0x1434   :  { %2206 = vrot.lane.b32.xlu1 %v2033_v45, %s3552_s27 }
0x149e   :  { %v2132_v47 = vpop.permute.xlu0 %2131 }
0x149f   :  { %3151 = vmatmul.mubr.msk.f32.vlgmr.msra.gmra.mrb[20].mxu0 %vm249_vm9, %v2132_v47  ;;  %3173 = vmatmul.mubr.msk.f32.vlgmr.msra.gmra.mrb[22].mxu1 %vm249_vm9, %v2132_v47 }
0x14a0   :  { %3359 = vmatpush3.bf16.msra.mxu0 %v3812_v46  ;;  %3161 = vmatprep.mubr.msk.f32.mxu0 %vm3550_vm8, %v3551_v57 }
0x14a1   :  { %3360 = vmatprep.subr.bf16.mxu0 %v3549_v50  ;;  %3371 = vmatpush3.bf16.msra.mxu1 %v3793_v38 }
0x14a2   :  { %3372 = vmatprep.subr.bf16.mxu1 %v3549_v50  ;;  %3183 = vmatprep.mubr.msk.f32.mxu1 %vm3550_vm8, %v3551_v57 }
0x14a4   :  { %3362 = vmatpush3.bf16.msra.mxu0 %v3823_v51 }
0x14a5   :  { %3374 = vmatpush3.bf16.msra.mxu1 %v3799_v40 }
0x14a6   :  { %v2207_v48 = vpop.permute.xlu1 %2206  ;;  %3375 = vmatprep.subr.bf16.mxu1 %v3549_v50 }
0x14a7   :  { %3162 = vmatmul.mubr.msk.f32.vlgmr.msra.gmra.mrb[20].mxu0 %vm249_vm9, %v2207_v48 }
0x1572   :  { %v2372_v13 = vpop.f32.mrb[22].mxu1 }
0x1573   :  { %v2376_v49 = vadd.f32 %v2372_v13, %v3775_v17  ;;  %v3174_v11 = vpop.f32.mrb[23].mxu1 }
0x1575   :  { %3519 = vtanh.f32 %v2376_v49  ;;  %v2704_v40 = vmul.f32 -1.442695, %v2376_v49 }
0x157a   :  { %v2276_v38 = vpop.f32.mrb[20].mxu0 }
0x157b   :  { %v3387_v52 = vadd.f32 %v3850_v59, %v2276_v38  ;;  %v3163_v54 = vpop.f32.mrb[21].mxu0 }
0x157d   :  { %3521 = vtanh.f32 %v3387_v52  ;;  %v2702_v60 = vmul.f32 -1.442695, %v3387_v52 }
0x157e   :  { %3523 = vpow2.f32 %v2704_v40 }
0x157f   :  { %v3520_v55 = vpop.eup %3519  ;;  %3525 = vpow2.f32 %v2702_v60 }
0x1580   :  { %2386 = vrot.lane.b32.xlu0 %v3520_v55, %s3553_s4 }
0x1587   :  { %v3522_v58 = vpop.eup %3521 }
0x1588   :  { %2290 = vrot.lane.b32.xlu1 %v3522_v58, %s3553_s4  ;;  %v3524_v61 = vpop.eup %3523 }
0x1589   :  { %v2380_v62 = vadd.f32 1.0, %v3524_v61  ;;  %v3526_v17 = vpop.eup %3525 }
0x158a   :  { %v2284_v63 = vadd.f32 1.0, %v3526_v17 }
0x158b   :  { %3527 = vrcp.f32 %v2380_v62 }
0x158c   :  { %3529 = vrcp.f32 %v2284_v63 }
0x1595   :  { %v3528_v0 = vpop.eup %3527 }
0x1596   :  { %v3530_v3 = vpop.eup %3529  ;;  %v2384_v6 = vmul.f32 %v3528_v0, %v2123_v34 }
0x1597   :  { %v2288_v8 = vmul.f32 %v3530_v3, %v2027_v37 }
0x15f2   :  { %v2387_v1 = vpop.permute.xlu0 %2386 }
0x15f3   :  { %v2389_v2 = vmul.f32 %v3528_v0, %v2387_v1 }
0x15f5   :  { %2391 = vrot.lane.b32.xlu0 %v2389_v2, %s3552_s27 }
0x15fa   :  { %v2291_v4 = vpop.permute.xlu1 %2290 }
0x15fb   :  { %v2293_v5 = vmul.f32 %v3530_v3, %v2291_v4 }
0x15fd   :  { %2295 = vrot.lane.b32.xlu1 %v2293_v5, %s3552_s27 }
0x1667   :  { %v2392_v7 = vpop.permute.xlu0 %2391 }
0x1668   :  { %v2394_v15 = vadd.f32 %v2392_v7, %v2384_v6 }
0x166a   :  { %3531 = vtanh.f32 %v2394_v15 }
0x166f   :  { %v2296_v10 = vpop.permute.xlu1 %2295 }
0x1670   :  { %v2298_v12 = vadd.f32 %v2296_v10, %v2288_v8 }
0x1672   :  { %3533 = vtanh.f32 %v2298_v12 }
0x1674   :  { %v3532_v14 = vpop.eup %3531 }
0x1675   :  { %2397 = vrot.lane.b32.xlu0 %v3532_v14, %s3553_s4 }
0x167c   :  { %v3534_v16 = vpop.eup %3533 }
0x167d   :  { %2301 = vrot.lane.b32.xlu1 %v3534_v16, %s3553_s4 }
0x16e7   :  { %v2398_v18 = vpop.permute.xlu0 %2397 }
0x16e8   :  { %v2400_v20 = vmul.f32 %v3528_v0, %v2398_v18 }
0x16ea   :  { %2402 = vrot.lane.b32.xlu0 %v2400_v20, %s3552_s27 }
0x16ef   :  { %v2302_v21 = vpop.permute.xlu1 %2301 }
0x16f0   :  { %v2304_v53 = vmul.f32 %v3530_v3, %v2302_v21 }
0x16f2   :  { %2477 = vrot.lane.b32.xlu1 %v2304_v53, %s3552_s27 }
0x175c   :  { %v2403_v22 = vpop.permute.xlu0 %2402 }
0x175d   :  { %2577 = vst.msk [vmem:[%s4134_s13] sm:$0xff] %vm249_vm9, %v2403_v22  ;;  %3184 = vmatmul.mubr.msk.f32.vlgmr.msra.gmra.mrb[24].mxu1 %vm249_vm9, %v2403_v22 }
0x175e   :  { %3377 = vmatpush3.bf16.msra.mxu1 %v3812_v46  ;;  %3194 = vmatprep.mubr.msk.f32.mxu1 %vm3550_vm8, %v3551_v57 }
0x175f   :  { %3378 = vmatprep.subr.bf16.mxu1 %v3549_v50 }
0x1762   :  { %3380 = vmatpush3.bf16.msra.mxu1 %v3823_v51  ;;  %v2710_v51 = vld [vmem:[%s4135_s10] ss:$0 sm:$0xff] }
0x1764   :  { %v2478_v23 = vpop.permute.xlu1 %2477 }
0x1765   :  { %3195 = vmatmul.mubr.msk.f32.vlgmr.msra.gmra.mrb[24].mxu1 %vm249_vm9, %v2478_v23 }
0x1838   :  { %v2547_v56 = vpop.f32.mrb[24].mxu1 }
0x1839   :  { %v3388_v24 = vadd.f32 %v3850_v59, %v2547_v56  ;;  %v3196_v25 = vpop.f32.mrb[25].mxu1 }
0x183b   :  { %3535 = vtanh.f32 %v3388_v24  ;;  %v2707_v26 = vmul.f32 -1.442695, %v3388_v24 }
0x183d   :  { %3537 = vpow2.f32 %v2707_v26 }
0x1845   :  { %v3536_v19 = vpop.eup %3535 }
0x1846   :  { %2561 = vrot.lane.b32.xlu0 %v3536_v19, %s3553_s4 }
0x1847   :  { %v3538_v46 = vpop.eup %3537 }
0x1848   :  { %v2555_v27 = vadd.f32 1.0, %v3538_v46 }
0x184a   :  { %3539 = vrcp.f32 %v2555_v27 }
0x1854   :  { %v3540_v57 = vpop.eup %3539 }
0x1855   :  { %v2559_v59 = vmul.f32 %v3540_v57, %v2298_v12 }
0x18b8   :  { %v2562_v50 = vpop.permute.xlu0 %2561 }
0x18b9   :  { %v2564_v28 = vmul.f32 %v3540_v57, %v2562_v50 }
0x18bb   :  { %2566 = vrot.lane.b32.xlu1 %v2564_v28, %s3552_s27 }
0x18bf   :  { %2602 = vrot.lane.b32.xlu1 %v2710_v51, %s3554_s17 }
0x192d   :  { %v2567_v29 = vpop.permute.xlu1 %2566 }
0x192e   :  { %v2569_v30 = vadd.f32 %v2567_v29, %v2559_v59 }
0x1930   :  { %3541 = vtanh.f32 %v2569_v30 }
0x1931   :  { %v2603_v32 = vpop.permute.xlu1 %2602 }
0x193a   :  { %v3542_v9 = vpop.eup %3541 }
0x193b   :  { %2572 = vrot.lane.b32.xlu0 %v3542_v9, %s3553_s4 }
0x19ad   :  { %v2573_v31 = vpop.permute.xlu0 %2572 }
0x19ae   :  { %v2575_v33 = vmul.f32 %v3540_v57, %v2573_v31 }
0x19b0   :  { %v2605_v34 = vmul.f32 %v2603_v32, %v2575_v33 }
0x19b2   :  { %2607 = vrot.lane.b32.xlu0 %v2605_v34, %s3552_s27 }
0x19b6   :  { %2579 = vrot.lane.b32.xlu0 %v2394_v15, %s3554_s17 }
0x19ba   :  { %2584 = vrot.lane.b32.xlu0 %v2575_v33, %s3552_s27 }
0x19be   :  { %2590 = vrot.lane.b32.xlu0 %v2569_v30, %s3554_s17 }
0x1a24   :  { %v2608_v36 = vpop.permute.xlu0 %2607 }
0x1a25   :  { %v2610_v37 = vsel %vm249_vm9, %v2608_v36, 0.0 }
0x1a26   :  { %2611 = vadd.xlane.f32.xlu1 %v2610_v37 }
0x1a28   :  { %v2580_v39 = vpop.permute.xlu0 %2579 }
0x1a29   :  { %2582 = vst.msk [vmem:[%s4137_s14] sm:$0xff] %vm249_vm9, %v2580_v39 }
0x1a2c   :  { %v2585_v41 = vpop.permute.xlu0 %2584 }
0x1a2d   :  { %2708 = vst.msk [vmem:[%s4134_s13 + $0x8] sm:$0xff] %vm249_vm9, %v2585_v41 }
0x1a30   :  { %v2591_v42 = vpop.permute.xlu0 %2590 }
0x1a31   :  { %2709 = vst.msk [vmem:[%s4137_s14 + $0x8] sm:$0xff] %vm249_vm9, %v2591_v42 }
0x1ab3   :  { %v2612_v44 = vpop.xlane.xlu1 %2611 }
0x1ab4   :  { %v2619_v45 = vadd.f32 %v2711_v43, %v2612_v44 }
0x1ab6   :  { %v2712_v47 = vmul.f32 -1.442695, %v2619_v45 }
0x1ab8   :  { %3543 = vpow2.f32 %v2712_v47 }
0x1ac2   :  { %v3544_v48 = vpop.eup %3543 }
0x1ac3   :  { %v2623_v13 = vadd.f32 1.0, %v3544_v48 }
0x1ac5   :  { %3545 = vrcp.f32 %v2623_v13 }
0x1acf   :  { %v3546_v49 = vpop.eup %3545 }
0x1ad0   :  { %2627 = vst.msk [vmem:[%s4138_s12] sm:$0xff] %vm2626_vm10, %v3546_v49 }

</bundles_post_ra>
